<compile_context>
chip_gen: v7x
topology: tpu7x:2x2x1
jax: 0.10.0
libtpu: 0.0.40
codegen_flags: <defaults>
</compile_context>

<pallas_src>
import functools

import jax
import jax.numpy as jnp
from jax.experimental import pallas as pl
from jax.experimental.pallas import tpu as pltpu


# --------------------------------- kernel -----------------------------------


def _ffm_fused_kernel(xp_ref, w1_ref, s1_ref, b1_ref, w2_ref, b2_ref,
                      w3_ref, b3_ref, out_ref, sum_ref, *, tile_h, inv_hw):
    # xp_ref : (1, H+2, Wp, 2C) bf16 zero-padded, channel-concatenated [seg;det]
    # w1_ref : (9, 2C, C) bf16 conv taps, t = dy*3 + dx
    # s1/b1  : (1, C) f32 folded BN scale / bias
    # w2/w3  : (C, C) bf16 1x1-conv weights (Cin, Cout); b2/b3: (1, C) f32
    # out_ref: (1, H, W, C) f32, VMEM-resident across the row-tile axis
    # sum_ref: (1, C) f32 scratch, per-batch spatial sum
    t = pl.program_id(1)
    n_t = pl.num_programs(1)
    _, H, W, C = out_ref.shape
    Wp = xp_ref.shape[2]
    C2 = xp_ref.shape[3]
    TH = tile_h
    row0 = pl.multiple_of(t * TH, TH)

    @pl.when(t == 0)
    def _():
        sum_ref[...] = jnp.zeros_like(sum_ref)

    # ---- 3x3 conv over one row band: 3 contiguous loads, 9 full-width matmuls,
    #      dx shift applied once on the C-wide f32 per-dx accumulators.
    n = TH * Wp
    accs = [jnp.zeros((n, C), jnp.float32) for _ in range(3)]
    for dy in range(3):
        # contiguous (TH, Wp, 2C) band; Wp % 8 == 0 so the flatten is cheap
        win = xp_ref[0, pl.ds(row0 + dy, TH), :, :].reshape(n, C2)   # bf16
        for dx in range(3):
            accs[dx] = accs[dx] + jnp.dot(
                win, w1_ref[dy * 3 + dx], preferred_element_type=jnp.float32)
    a0 = accs[0].reshape(TH, Wp, C)
    a1 = accs[1].reshape(TH, Wp, C)
    a2 = accs[2].reshape(TH, Wp, C)
    conv = a0[:, 0:W, :] + a1[:, 1:W + 1, :] + a2[:, 2:W + 2, :]     # (TH, W, C)

    y = jnp.maximum(conv * s1_ref[...] + b1_ref[...], 0.0)           # BN + ReLU, f32
    out_ref[0, pl.ds(row0, TH), :, :] = y                            # feat stays in VMEM
    sum_ref[...] += jnp.sum(y, axis=(0, 1))[None, :]                 # pool accumulator

    # ---- last row tile of this batch: channel attention + in-place apply.
    @pl.when(t == n_t - 1)
    def _():
        m = sum_ref[...] * inv_hw                                    # (1, C) spatial mean
        m8 = jnp.broadcast_to(m, (8, C)).astype(jnp.bfloat16)        # fill a sublane tile
        h = jnp.dot(m8, w2_ref[...], preferred_element_type=jnp.float32) + b2_ref[...]
        h = jnp.maximum(h, 0.0).astype(jnp.bfloat16)
        z = jnp.dot(h, w3_ref[...], preferred_element_type=jnp.float32) + b3_ref[...]
        a = 1.0 / (1.0 + jnp.exp(-z[0:1, :]))                        # sigmoid (EUP exp)
        att = a.reshape(1, 1, 1, C)
        # a*feat + feat  ==  feat * (1 + a)  on the resident image
        out_ref[...] = out_ref[...] * (1.0 + att)


# -------------------------------- wrapper ------------------------------------


def ffm_forward(seg_nchw, det_nchw, p, *, max_tile_h=32):
    """FFMModule forward.  Inputs/output NCHW (PyTorch convention)."""
    B, C, H, W = seg_nchw.shape

    # NCHW -> NHWC in bf16 (halves the boundary-copy + conv-input HBM bytes).
    seg = jnp.transpose(seg_nchw.astype(jnp.bfloat16), (0, 2, 3, 1))
    det = jnp.transpose(det_nchw.astype(jnp.bfloat16), (0, 2, 3, 1))
    x = jnp.concatenate([seg, det], axis=-1)                         # (B, H, W, 2C)

    # 1-px conv pad; right-pad width to a multiple of 8 so in-kernel reshapes are
    # sublane-aligned.  Extra columns are zero and discarded inside the kernel.
    Wp = ((W + 2 + 7) // 8) * 8
    xp = jnp.pad(x, ((0, 0), (1, 1), (1, Wp - W - 1), (0, 0)))

    # Largest row tile <= max_tile_h that divides H exactly (no silent fallback).
    TH = 1
    for cand in range(min(max_tile_h, H), 0, -1):
        if H % cand == 0:
            TH = cand
            break
    n_th = H // TH

    # Size the scoped-VMEM limit from the actual chip (v5e/v6e: 128 MiB physical,
    # v7x: 64 MiB) instead of a fixed cap.
    try:
        vmem_cap = int(getattr(pltpu.get_tpu_info(), "vmem_capacity_bytes",
                               64 * 1024 * 1024))
    except Exception:  # pragma: no cover - conservative fallback
        vmem_cap = 64 * 1024 * 1024
    vmem_limit = min((vmem_cap * 3) // 4, 100 * 1024 * 1024)

    w1 = p["w1_k"].astype(jnp.bfloat16)
    w2 = p["w2_k"].astype(jnp.bfloat16)
    w3 = p["w3_k"].astype(jnp.bfloat16)
    s1, b1 = p["s1"][None, :], p["b1"][None, :]
    b2, b3 = p["b2"][None, :], p["b3"][None, :]

    kernel = functools.partial(_ffm_fused_kernel, tile_h=TH,
                               inv_hw=1.0 / float(H * W))

    out = pl.pallas_call(
        kernel,
        out_shape=jax.ShapeDtypeStruct((B, H, W, C), jnp.float32),
        grid=(B, n_th),
        in_specs=[
            # full padded image per batch; invariant along the row-tile axis
            pl.BlockSpec((1, H + 2, Wp, 2 * C), lambda b, t: (b, 0, 0, 0)),
            pl.BlockSpec((9, 2 * C, C), lambda b, t: (0, 0, 0)),
            pl.BlockSpec((1, C), lambda b, t: (0, 0)),
            pl.BlockSpec((1, C), lambda b, t: (0, 0)),
            pl.BlockSpec((C, C), lambda b, t: (0, 0)),
            pl.BlockSpec((1, C), lambda b, t: (0, 0)),
            pl.BlockSpec((C, C), lambda b, t: (0, 0)),
            pl.BlockSpec((1, C), lambda b, t: (0, 0)),
        ],
        # whole per-batch output resident across the row axis (written back at
        # batch changes), doubles as the feat buffer -> no feat HBM round trip
        out_specs=pl.BlockSpec((1, H, W, C), lambda b, t: (b, 0, 0, 0)),
        scratch_shapes=[pltpu.VMEM((1, C), jnp.float32)],
        compiler_params=pltpu.CompilerParams(
            dimension_semantics=("parallel", "arbitrary"),
            vmem_limit_bytes=vmem_limit),
    )(xp, w1, s1, b1, w2, b2, w3, b3)

    # TODO(synk): accept NHWC at the module boundary to drop this transpose copy.
    return jnp.transpose(out, (0, 3, 1, 2))


# ---------------------------- params & reference -----------------------------


def make_params(key, c):
    ks = jax.random.split(key, 9)
    p = {}
    w1_scale = (2.0 / (9 * 2 * c)) ** 0.5
    w_scale = (1.0 / c) ** 0.5
    # conv1: 3x3, 2c -> c, bias-free
    p["w1_pt"] = jax.random.normal(ks[0], (c, 2 * c, 3, 3), jnp.float32) * w1_scale
    # folded BN (eval mode, running stats)
    gamma = jax.random.uniform(ks[1], (c,), jnp.float32, 0.5, 1.5)
    beta = jax.random.normal(ks[2], (c,), jnp.float32) * 0.1
    mean = jax.random.normal(ks[3], (c,), jnp.float32) * 0.1
    var = jax.random.uniform(ks[4], (c,), jnp.float32, 0.5, 1.5)
    p["s1"] = gamma / jnp.sqrt(var + 1e-5)
    p["b1"] = beta - mean * p["s1"]
    # conv2 / conv3: 1x1, c -> c, with bias
    p["w2_pt"] = jax.random.normal(ks[5], (c, c, 1, 1), jnp.float32) * w_scale
    p["b2"] = jax.random.normal(ks[6], (c,), jnp.float32) * 0.1
    p["w3_pt"] = jax.random.normal(ks[7], (c, c, 1, 1), jnp.float32) * w_scale
    p["b3"] = jax.random.normal(ks[8], (c,), jnp.float32) * 0.1

    # kernel-format weights: taps-major, channels-last
    p["w1_k"] = jnp.transpose(p["w1_pt"], (2, 3, 1, 0)).reshape(9, 2 * c, c)
    p["w2_k"] = p["w2_pt"][:, :, 0, 0].T        # (Cin, Cout)
    p["w3_k"] = p["w3_pt"][:, :, 0, 0].T
    return p


def reference_forward(seg, det, p):
    """Pure-JAX reference (NCHW), same bf16-operand / f32-accumulate numerics."""
    x = jnp.concatenate([seg, det], axis=1)
    y = jax.lax.conv_general_dilated(
        x.astype(jnp.bfloat16), p["w1_pt"].astype(jnp.bfloat16),
        (1, 1), [(1, 1), (1, 1)],
        dimension_numbers=("NCHW", "OIHW", "NCHW"),
        preferred_element_type=jnp.float32)
    feat = jax.nn.relu(y * p["s1"][None, :, None, None]
                       + p["b1"][None, :, None, None])
    m = jnp.mean(feat, axis=(2, 3))                                     # (B, C)
    h = jax.nn.relu(jnp.dot(m.astype(jnp.bfloat16), p["w2_k"].astype(jnp.bfloat16),
                            preferred_element_type=jnp.float32) + p["b2"][None, :])
    a = jax.nn.sigmoid(jnp.dot(h.astype(jnp.bfloat16), p["w3_k"].astype(jnp.bfloat16),
                               preferred_element_type=jnp.float32) + p["b3"][None, :])
    a = a[:, :, None, None]
    return a * feat + feat


# ----------------------------------- main ------------------------------------


if __name__ == "__main__":
    def run_case(B, C, H, W, max_tile_h):
        key = jax.random.PRNGKey(0)
        k_seg, k_det, k_p = jax.random.split(key, 3)
        seg = jax.random.normal(k_seg, (B, C, H, W), jnp.float32)
        det = jax.random.normal(k_det, (B, C, H, W), jnp.float32)
        params = make_params(k_p, C)

        fwd = jax.jit(functools.partial(ffm_forward, max_tile_h=max_tile_h))
        out = jax.block_until_ready(fwd(seg, det, params))
        assert out.shape == (B, C, H, W), out.shape

        ref = reference_forward(seg, det, params)
        err = float(jnp.max(jnp.abs(out - ref)))
        scale = float(jnp.max(jnp.abs(ref)))
        assert err <= 5e-3 * (1.0 + scale), (err, scale)

    # module-default small shape (matches the PyTorch spec's tiny config)
    run_case(2, 4, 16, 16, max_tile_h=32)
    # lane-dense, multi-row-tile path: C=128 channels on lanes, 4 row tiles of 8
    # rows each -> exercises the pool-sum accumulator and shifted-window slices.
    run_case(2, 128, 32, 32, max_tile_h=8)

    print("KERNEL_OK")
</pallas_src>

<mosaic_0001>
module attributes {stable_mosaic.version = 11 : i64} {
  func.func @_ffm_fused_kernel(%arg0: i32, %arg1: i32, %arg2: memref<1x18x24x8xbf16, #tpu.memory_space<vmem>>, %arg3: memref<9x8x4xbf16, #tpu.memory_space<vmem>>, %arg4: memref<1x4xf32, #tpu.memory_space<vmem>>, %arg5: memref<1x4xf32, #tpu.memory_space<vmem>>, %arg6: memref<4x4xbf16, #tpu.memory_space<vmem>>, %arg7: memref<1x4xf32, #tpu.memory_space<vmem>>, %arg8: memref<4x4xbf16, #tpu.memory_space<vmem>>, %arg9: memref<1x4xf32, #tpu.memory_space<vmem>>, %arg10: memref<1x16x16x4xf32, #tpu.memory_space<vmem>>, %arg11: memref<1x4xf32, #tpu.memory_space<vmem>>) attributes {dimension_semantics = [#tpu.dimension_semantics<parallel>, #tpu.dimension_semantics<arbitrary>], iteration_bounds = array<i64: 2, 1>, scalar_prefetch = 0 : i64, scratch_operands = 1 : i64, tpu.core_type = #tpu.core_type<tc>, window_params = [{transform_indices = @transform_0, window_bounds = array<i64: 1, 18, 24, 8>}, {pipeline_mode = #tpu.pipeline_mode<synchronous>, transform_indices = @transform_1, window_bounds = array<i64: 9, 8, 4>}, {pipeline_mode = #tpu.pipeline_mode<synchronous>, transform_indices = @transform_2, window_bounds = array<i64: 1, 4>}, {pipeline_mode = #tpu.pipeline_mode<synchronous>, transform_indices = @transform_3, window_bounds = array<i64: 1, 4>}, {pipeline_mode = #tpu.pipeline_mode<synchronous>, transform_indices = @transform_4, window_bounds = array<i64: 4, 4>}, {pipeline_mode = #tpu.pipeline_mode<synchronous>, transform_indices = @transform_5, window_bounds = array<i64: 1, 4>}, {pipeline_mode = #tpu.pipeline_mode<synchronous>, transform_indices = @transform_6, window_bounds = array<i64: 4, 4>}, {pipeline_mode = #tpu.pipeline_mode<synchronous>, transform_indices = @transform_7, window_bounds = array<i64: 1, 4>}, {transform_indices = @transform_8, window_bounds = array<i64: 1, 16, 16, 4>}]} {
    %c16_i32 = arith.constant 16 : i32
    %0 = arith.muli %arg1, %c16_i32 : i32
    %1 = tpu.assume_multiple %0, 16 : i32
    %c0_i32 = arith.constant 0 : i32
    %2 = arith.cmpi eq, %arg1, %c0_i32 : i32
    %3 = arith.extui %2 : i1 to i32
    %c0_i32_0 = arith.constant 0 : i32
    %4 = arith.cmpi ne, %3, %c0_i32_0 : i32
    scf.if %4 {
      %cst_55 = arith.constant 0.000000e+00 : f32
      %89 = vector.broadcast %cst_55 : f32 to vector<1x4xf32>
      %c0_56 = arith.constant 0 : index
      %c0_57 = arith.constant 0 : index
      %90 = vector.load %arg11[%c0_56, %c0_57] : memref<1x4xf32, #tpu.memory_space<vmem>>, vector<1x4xf32>
      tpu.vector_store %arg11[%c0_56, %c0_57], %89 {strides = array<i32>} : memref<1x4xf32, #tpu.memory_space<vmem>>, vector<1x4xf32>,
    } else {
    }
    %cst = arith.constant 0.000000e+00 : f32
    %5 = vector.broadcast %cst : f32 to vector<384x4xf32>
    %cst_1 = arith.constant 0.000000e+00 : f32
    %6 = vector.broadcast %cst_1 : f32 to vector<384x4xf32>
    %cst_2 = arith.constant 0.000000e+00 : f32
    %7 = vector.broadcast %cst_2 : f32 to vector<384x4xf32>
    %c0_i32_3 = arith.constant 0 : i32
    %8 = arith.addi %1, %c0_i32_3 : i32
    %c0 = arith.constant 0 : index
    %9 = arith.index_cast %8 : i32 to index
    %c0_4 = arith.constant 0 : index
    %c0_5 = arith.constant 0 : index
    %10 = vector.load %arg2[%c0, %9, %c0_4, %c0_5] : memref<1x18x24x8xbf16, #tpu.memory_space<vmem>>, vector<1x16x24x8xbf16>
    %11 = vector.shape_cast %10 : vector<1x16x24x8xbf16> to vector<16x24x8xbf16>
    %12 = vector.shape_cast %11 : vector<16x24x8xbf16> to vector<384x8xbf16>
    %c0_6 = arith.constant 0 : index
    %c0_7 = arith.constant 0 : index
    %c0_8 = arith.constant 0 : index
    %13 = vector.load %arg3[%c0_6, %c0_7, %c0_8] : memref<9x8x4xbf16, #tpu.memory_space<vmem>>, vector<1x8x4xbf16>
    %14 = vector.shape_cast %13 : vector<1x8x4xbf16> to vector<8x4xbf16>
    %cst_9 = arith.constant dense<0.000000e+00> : vector<384x4xf32>
    %15 = tpu.matmul %12, %14, %cst_9 {dimension_numbers = #tpu.dot_dimension_numbers<[1], [0], [0], [1], [0, 0, 1, 1], [], []>} : vector<384x8xbf16>, vector<8x4xbf16>, vector<384x4xf32> -> vector<384x4xf32>
    %16 = arith.addf %5, %15 : vector<384x4xf32>
    %c1 = arith.constant 1 : index
    %c0_10 = arith.constant 0 : index
    %c0_11 = arith.constant 0 : index
    %17 = vector.load %arg3[%c1, %c0_10, %c0_11] : memref<9x8x4xbf16, #tpu.memory_space<vmem>>, vector<1x8x4xbf16>
    %18 = vector.shape_cast %17 : vector<1x8x4xbf16> to vector<8x4xbf16>
    %cst_12 = arith.constant dense<0.000000e+00> : vector<384x4xf32>
    %19 = tpu.matmul %12, %18, %cst_12 {dimension_numbers = #tpu.dot_dimension_numbers<[1], [0], [0], [1], [0, 0, 1, 1], [], []>} : vector<384x8xbf16>, vector<8x4xbf16>, vector<384x4xf32> -> vector<384x4xf32>
    %20 = arith.addf %6, %19 : vector<384x4xf32>
    %c2 = arith.constant 2 : index
    %c0_13 = arith.constant 0 : index
    %c0_14 = arith.constant 0 : index
    %21 = vector.load %arg3[%c2, %c0_13, %c0_14] : memref<9x8x4xbf16, #tpu.memory_space<vmem>>, vector<1x8x4xbf16>
    %22 = vector.shape_cast %21 : vector<1x8x4xbf16> to vector<8x4xbf16>
    %cst_15 = arith.constant dense<0.000000e+00> : vector<384x4xf32>
    %23 = tpu.matmul %12, %22, %cst_15 {dimension_numbers = #tpu.dot_dimension_numbers<[1], [0], [0], [1], [0, 0, 1, 1], [], []>} : vector<384x8xbf16>, vector<8x4xbf16>, vector<384x4xf32> -> vector<384x4xf32>
    %24 = arith.addf %7, %23 : vector<384x4xf32>
    %c1_i32 = arith.constant 1 : i32
    %25 = arith.addi %1, %c1_i32 : i32
    %c0_16 = arith.constant 0 : index
    %26 = arith.index_cast %25 : i32 to index
    %c0_17 = arith.constant 0 : index
    %c0_18 = arith.constant 0 : index
    %27 = vector.load %arg2[%c0_16, %26, %c0_17, %c0_18] : memref<1x18x24x8xbf16, #tpu.memory_space<vmem>>, vector<1x16x24x8xbf16>
    %28 = vector.shape_cast %27 : vector<1x16x24x8xbf16> to vector<16x24x8xbf16>
    %29 = vector.shape_cast %28 : vector<16x24x8xbf16> to vector<384x8xbf16>
    %c3 = arith.constant 3 : index
    %c0_19 = arith.constant 0 : index
    %c0_20 = arith.constant 0 : index
    %30 = vector.load %arg3[%c3, %c0_19, %c0_20] : memref<9x8x4xbf16, #tpu.memory_space<vmem>>, vector<1x8x4xbf16>
    %31 = vector.shape_cast %30 : vector<1x8x4xbf16> to vector<8x4xbf16>
    %cst_21 = arith.constant dense<0.000000e+00> : vector<384x4xf32>
    %32 = tpu.matmul %29, %31, %cst_21 {dimension_numbers = #tpu.dot_dimension_numbers<[1], [0], [0], [1], [0, 0, 1, 1], [], []>} : vector<384x8xbf16>, vector<8x4xbf16>, vector<384x4xf32> -> vector<384x4xf32>
    %33 = arith.addf %16, %32 : vector<384x4xf32>
    %c4 = arith.constant 4 : index
    %c0_22 = arith.constant 0 : index
    %c0_23 = arith.constant 0 : index
    %34 = vector.load %arg3[%c4, %c0_22, %c0_23] : memref<9x8x4xbf16, #tpu.memory_space<vmem>>, vector<1x8x4xbf16>
    %35 = vector.shape_cast %34 : vector<1x8x4xbf16> to vector<8x4xbf16>
    %cst_24 = arith.constant dense<0.000000e+00> : vector<384x4xf32>
    %36 = tpu.matmul %29, %35, %cst_24 {dimension_numbers = #tpu.dot_dimension_numbers<[1], [0], [0], [1], [0, 0, 1, 1], [], []>} : vector<384x8xbf16>, vector<8x4xbf16>, vector<384x4xf32> -> vector<384x4xf32>
    %37 = arith.addf %20, %36 : vector<384x4xf32>
    %c5 = arith.constant 5 : index
    %c0_25 = arith.constant 0 : index
    %c0_26 = arith.constant 0 : index
    %38 = vector.load %arg3[%c5, %c0_25, %c0_26] : memref<9x8x4xbf16, #tpu.memory_space<vmem>>, vector<1x8x4xbf16>
    %39 = vector.shape_cast %38 : vector<1x8x4xbf16> to vector<8x4xbf16>
    %cst_27 = arith.constant dense<0.000000e+00> : vector<384x4xf32>
    %40 = tpu.matmul %29, %39, %cst_27 {dimension_numbers = #tpu.dot_dimension_numbers<[1], [0], [0], [1], [0, 0, 1, 1], [], []>} : vector<384x8xbf16>, vector<8x4xbf16>, vector<384x4xf32> -> vector<384x4xf32>
    %41 = arith.addf %24, %40 : vector<384x4xf32>
    %c2_i32 = arith.constant 2 : i32
    %42 = arith.addi %1, %c2_i32 : i32
    %c0_28 = arith.constant 0 : index
    %43 = arith.index_cast %42 : i32 to index
    %c0_29 = arith.constant 0 : index
    %c0_30 = arith.constant 0 : index
    %44 = vector.load %arg2[%c0_28, %43, %c0_29, %c0_30] : memref<1x18x24x8xbf16, #tpu.memory_space<vmem>>, vector<1x16x24x8xbf16>
    %45 = vector.shape_cast %44 : vector<1x16x24x8xbf16> to vector<16x24x8xbf16>
    %46 = vector.shape_cast %45 : vector<16x24x8xbf16> to vector<384x8xbf16>
    %c6 = arith.constant 6 : index
    %c0_31 = arith.constant 0 : index
    %c0_32 = arith.constant 0 : index
    %47 = vector.load %arg3[%c6, %c0_31, %c0_32] : memref<9x8x4xbf16, #tpu.memory_space<vmem>>, vector<1x8x4xbf16>
    %48 = vector.shape_cast %47 : vector<1x8x4xbf16> to vector<8x4xbf16>
    %cst_33 = arith.constant dense<0.000000e+00> : vector<384x4xf32>
    %49 = tpu.matmul %46, %48, %cst_33 {dimension_numbers = #tpu.dot_dimension_numbers<[1], [0], [0], [1], [0, 0, 1, 1], [], []>} : vector<384x8xbf16>, vector<8x4xbf16>, vector<384x4xf32> -> vector<384x4xf32>
    %50 = arith.addf %33, %49 : vector<384x4xf32>
    %c7 = arith.constant 7 : index
    %c0_34 = arith.constant 0 : index
    %c0_35 = arith.constant 0 : index
    %51 = vector.load %arg3[%c7, %c0_34, %c0_35] : memref<9x8x4xbf16, #tpu.memory_space<vmem>>, vector<1x8x4xbf16>
    %52 = vector.shape_cast %51 : vector<1x8x4xbf16> to vector<8x4xbf16>
    %cst_36 = arith.constant dense<0.000000e+00> : vector<384x4xf32>
    %53 = tpu.matmul %46, %52, %cst_36 {dimension_numbers = #tpu.dot_dimension_numbers<[1], [0], [0], [1], [0, 0, 1, 1], [], []>} : vector<384x8xbf16>, vector<8x4xbf16>, vector<384x4xf32> -> vector<384x4xf32>
    %54 = arith.addf %37, %53 : vector<384x4xf32>
    %c8 = arith.constant 8 : index
    %c0_37 = arith.constant 0 : index
    %c0_38 = arith.constant 0 : index
    %55 = vector.load %arg3[%c8, %c0_37, %c0_38] : memref<9x8x4xbf16, #tpu.memory_space<vmem>>, vector<1x8x4xbf16>
    %56 = vector.shape_cast %55 : vector<1x8x4xbf16> to vector<8x4xbf16>
    %cst_39 = arith.constant dense<0.000000e+00> : vector<384x4xf32>
    %57 = tpu.matmul %46, %56, %cst_39 {dimension_numbers = #tpu.dot_dimension_numbers<[1], [0], [0], [1], [0, 0, 1, 1], [], []>} : vector<384x8xbf16>, vector<8x4xbf16>, vector<384x4xf32> -> vector<384x4xf32>
    %58 = arith.addf %41, %57 : vector<384x4xf32>
    %59 = vector.shape_cast %50 : vector<384x4xf32> to vector<16x24x4xf32>
    %60 = vector.shape_cast %54 : vector<384x4xf32> to vector<16x24x4xf32>
    %61 = vector.shape_cast %58 : vector<384x4xf32> to vector<16x24x4xf32>
    %62 = vector.extract_strided_slice %59 {offsets = [0, 0, 0], sizes = [16, 16, 4], strides = [1, 1, 1]} : vector<16x24x4xf32> to vector<16x16x4xf32>
    %63 = vector.extract_strided_slice %60 {offsets = [0, 1, 0], sizes = [16, 16, 4], strides = [1, 1, 1]} : vector<16x24x4xf32> to vector<16x16x4xf32>
    %64 = arith.addf %62, %63 : vector<16x16x4xf32>
    %65 = vector.extract_strided_slice %61 {offsets = [0, 2, 0], sizes = [16, 16, 4], strides = [1, 1, 1]} : vector<16x24x4xf32> to vector<16x16x4xf32>
    %66 = arith.addf %64, %65 : vector<16x16x4xf32>
    %c0_40 = arith.constant 0 : index
    %c0_41 = arith.constant 0 : index
    %67 = vector.load %arg4[%c0_40, %c0_41] : memref<1x4xf32, #tpu.memory_space<vmem>>, vector<1x4xf32>
    %68 = vector.shape_cast %67 : vector<1x4xf32> to vector<1x1x4xf32>
    %69 = vector.broadcast %68 : vector<1x1x4xf32> to vector<16x16x4xf32>
    %70 = arith.mulf %66, %69 : vector<16x16x4xf32>
    %c0_42 = arith.constant 0 : index
    %c0_43 = arith.constant 0 : index
    %71 = vector.load %arg5[%c0_42, %c0_43] : memref<1x4xf32, #tpu.memory_space<vmem>>, vector<1x4xf32>
    %72 = vector.shape_cast %71 : vector<1x4xf32> to vector<1x1x4xf32>
    %73 = vector.broadcast %72 : vector<1x1x4xf32> to vector<16x16x4xf32>
    %74 = arith.addf %70, %73 : vector<16x16x4xf32>
    %cst_44 = arith.constant 0.000000e+00 : f32
    %75 = vector.broadcast %cst_44 : f32 to vector<16x16x4xf32>
    %76 = arith.maximumf %74, %75 : vector<16x16x4xf32>
    %c0_45 = arith.constant 0 : index
    %77 = arith.index_cast %1 : i32 to index
    %c0_46 = arith.constant 0 : index
    %c0_47 = arith.constant 0 : index
    %78 = vector.load %arg10[%c0_45, %77, %c0_46, %c0_47] : memref<1x16x16x4xf32, #tpu.memory_space<vmem>>, vector<1x16x16x4xf32>
    %79 = vector.shape_cast %78 : vector<1x16x16x4xf32> to vector<16x16x4xf32>
    %80 = vector.shape_cast %76 : vector<16x16x4xf32> to vector<1x16x16x4xf32>
    tpu.vector_store %arg10[%c0_45, %77, %c0_46, %c0_47], %80 {strides = array<i32>} : memref<1x16x16x4xf32, #tpu.memory_space<vmem>>, vector<1x16x16x4xf32>,
    %c0_48 = arith.constant 0 : index
    %c0_49 = arith.constant 0 : index
    %81 = vector.load %arg11[%c0_48, %c0_49] : memref<1x4xf32, #tpu.memory_space<vmem>>, vector<1x4xf32>
    %cst_50 = arith.constant dense<0.000000e+00> : vector<4xf32>
    %82 = vector.multi_reduction <add>, %76, %cst_50 [0, 1] : vector<16x16x4xf32> to vector<4xf32>
    %83 = vector.shape_cast %82 : vector<4xf32> to vector<1x4xf32>
    %84 = arith.addf %81, %83 : vector<1x4xf32>
    %c0_51 = arith.constant 0 : index
    %c0_52 = arith.constant 0 : index
    %85 = vector.load %arg11[%c0_51, %c0_52] : memref<1x4xf32, #tpu.memory_space<vmem>>, vector<1x4xf32>
    tpu.vector_store %arg11[%c0_51, %c0_52], %84 {strides = array<i32>} : memref<1x4xf32, #tpu.memory_space<vmem>>, vector<1x4xf32>,
    %c0_i32_53 = arith.constant 0 : i32
    %86 = arith.cmpi eq, %arg1, %c0_i32_53 : i32
    %87 = arith.extui %86 : i1 to i32
    %c0_i32_54 = arith.constant 0 : i32
    %88 = arith.cmpi ne, %87, %c0_i32_54 : i32
    scf.if %88 {
      %c0_55 = arith.constant 0 : index
      %c0_56 = arith.constant 0 : index
      %89 = vector.load %arg11[%c0_55, %c0_56] : memref<1x4xf32, #tpu.memory_space<vmem>>, vector<1x4xf32>
      %cst_57 = arith.constant 3.906250e-03 : f32
      %90 = vector.broadcast %cst_57 : f32 to vector<1x4xf32>
      %91 = arith.mulf %89, %90 : vector<1x4xf32>
      %92 = vector.shape_cast %91 : vector<1x4xf32> to vector<1x4xf32>
      %93 = vector.broadcast %92 : vector<1x4xf32> to vector<8x4xf32>
      %94 = arith.truncf %93 : vector<8x4xf32> to vector<8x4xbf16>
      %c0_58 = arith.constant 0 : index
      %c0_59 = arith.constant 0 : index
      %95 = vector.load %arg6[%c0_58, %c0_59] : memref<4x4xbf16, #tpu.memory_space<vmem>>, vector<4x4xbf16>
      %cst_60 = arith.constant dense<0.000000e+00> : vector<8x4xf32>
      %96 = tpu.matmul %94, %95, %cst_60 {dimension_numbers = #tpu.dot_dimension_numbers<[1], [0], [0], [1], [0, 0, 1, 1], [], []>} : vector<8x4xbf16>, vector<4x4xbf16>, vector<8x4xf32> -> vector<8x4xf32>
      %c0_61 = arith.constant 0 : index
      %c0_62 = arith.constant 0 : index
      %97 = vector.load %arg7[%c0_61, %c0_62] : memref<1x4xf32, #tpu.memory_space<vmem>>, vector<1x4xf32>
      %98 = vector.broadcast %97 : vector<1x4xf32> to vector<8x4xf32>
      %99 = arith.addf %96, %98 : vector<8x4xf32>
      %cst_63 = arith.constant 0.000000e+00 : f32
      %100 = vector.broadcast %cst_63 : f32 to vector<8x4xf32>
      %101 = arith.maximumf %99, %100 : vector<8x4xf32>
      %102 = arith.truncf %101 : vector<8x4xf32> to vector<8x4xbf16>
      %c0_64 = arith.constant 0 : index
      %c0_65 = arith.constant 0 : index
      %103 = vector.load %arg8[%c0_64, %c0_65] : memref<4x4xbf16, #tpu.memory_space<vmem>>, vector<4x4xbf16>
      %cst_66 = arith.constant dense<0.000000e+00> : vector<8x4xf32>
      %104 = tpu.matmul %102, %103, %cst_66 {dimension_numbers = #tpu.dot_dimension_numbers<[1], [0], [0], [1], [0, 0, 1, 1], [], []>} : vector<8x4xbf16>, vector<4x4xbf16>, vector<8x4xf32> -> vector<8x4xf32>
      %c0_67 = arith.constant 0 : index
      %c0_68 = arith.constant 0 : index
      %105 = vector.load %arg9[%c0_67, %c0_68] : memref<1x4xf32, #tpu.memory_space<vmem>>, vector<1x4xf32>
      %106 = vector.broadcast %105 : vector<1x4xf32> to vector<8x4xf32>
      %107 = arith.addf %104, %106 : vector<8x4xf32>
      %108 = vector.extract_strided_slice %107 {offsets = [0, 0], sizes = [1, 4], strides = [1, 1]} : vector<8x4xf32> to vector<1x4xf32>
      %cst_69 = arith.constant 0.000000e+00 : f32
      %109 = vector.broadcast %cst_69 : f32 to vector<1x4xf32>
      %110 = arith.subf %109, %108 : vector<1x4xf32>
      %111 = math.exp %110 : vector<1x4xf32>
      %cst_70 = arith.constant 1.000000e+00 : f32
      %112 = vector.broadcast %cst_70 : f32 to vector<1x4xf32>
      %113 = arith.addf %112, %111 : vector<1x4xf32>
      %cst_71 = arith.constant 1.000000e+00 : f32
      %114 = vector.broadcast %cst_71 : f32 to vector<1x4xf32>
      %115 = arith.divf %114, %113 : vector<1x4xf32>
      %116 = vector.shape_cast %115 : vector<1x4xf32> to vector<1x1x1x4xf32>
      %c0_72 = arith.constant 0 : index
      %c0_73 = arith.constant 0 : index
      %c0_74 = arith.constant 0 : index
      %c0_75 = arith.constant 0 : index
      %117 = vector.load %arg10[%c0_72, %c0_73, %c0_74, %c0_75] : memref<1x16x16x4xf32, #tpu.memory_space<vmem>>, vector<1x16x16x4xf32>
      %cst_76 = arith.constant 1.000000e+00 : f32
      %118 = vector.broadcast %cst_76 : f32 to vector<1x1x1x4xf32>
      %119 = arith.addf %118, %116 : vector<1x1x1x4xf32>
      %120 = vector.broadcast %119 : vector<1x1x1x4xf32> to vector<1x16x16x4xf32>
      %121 = arith.mulf %117, %120 : vector<1x16x16x4xf32>
      %c0_77 = arith.constant 0 : index
      %c0_78 = arith.constant 0 : index
      %c0_79 = arith.constant 0 : index
      %c0_80 = arith.constant 0 : index
      %122 = vector.load %arg10[%c0_77, %c0_78, %c0_79, %c0_80] : memref<1x16x16x4xf32, #tpu.memory_space<vmem>>, vector<1x16x16x4xf32>
      tpu.vector_store %arg10[%c0_77, %c0_78, %c0_79, %c0_80], %121 {strides = array<i32>} : memref<1x16x16x4xf32, #tpu.memory_space<vmem>>, vector<1x16x16x4xf32>,
    } else {
    }
    return
  }
  func.func @transform_0(%arg0: i32, %arg1: i32) -> (i32, i32, i32, i32) {
    %c0_i32 = arith.constant 0 : i32
    %c0_i32_0 = arith.constant 0 : i32
    %c0_i32_1 = arith.constant 0 : i32
    %c0_i32_2 = arith.constant 0 : i32
    return %arg0, %c0_i32, %c0_i32_0, %c0_i32_1 : i32, i32, i32, i32
  }
  func.func @transform_1(%arg0: i32, %arg1: i32) -> (i32, i32, i32) {
    %c0_i32 = arith.constant 0 : i32
    %c0_i32_0 = arith.constant 0 : i32
    %c0_i32_1 = arith.constant 0 : i32
    %c0_i32_2 = arith.constant 0 : i32
    return %c0_i32, %c0_i32_0, %c0_i32_1 : i32, i32, i32
  }
  func.func @transform_2(%arg0: i32, %arg1: i32) -> (i32, i32) {
    %c0_i32 = arith.constant 0 : i32
    %c0_i32_0 = arith.constant 0 : i32
    %c0_i32_1 = arith.constant 0 : i32
    return %c0_i32, %c0_i32_0 : i32, i32
  }
  func.func @transform_3(%arg0: i32, %arg1: i32) -> (i32, i32) {
    %c0_i32 = arith.constant 0 : i32
    %c0_i32_0 = arith.constant 0 : i32
    %c0_i32_1 = arith.constant 0 : i32
    return %c0_i32, %c0_i32_0 : i32, i32
  }
  func.func @transform_4(%arg0: i32, %arg1: i32) -> (i32, i32) {
    %c0_i32 = arith.constant 0 : i32
    %c0_i32_0 = arith.constant 0 : i32
    %c0_i32_1 = arith.constant 0 : i32
    return %c0_i32, %c0_i32_0 : i32, i32
  }
  func.func @transform_5(%arg0: i32, %arg1: i32) -> (i32, i32) {
    %c0_i32 = arith.constant 0 : i32
    %c0_i32_0 = arith.constant 0 : i32
    %c0_i32_1 = arith.constant 0 : i32
    return %c0_i32, %c0_i32_0 : i32, i32
  }
  func.func @transform_6(%arg0: i32, %arg1: i32) -> (i32, i32) {
    %c0_i32 = arith.constant 0 : i32
    %c0_i32_0 = arith.constant 0 : i32
    %c0_i32_1 = arith.constant 0 : i32
    return %c0_i32, %c0_i32_0 : i32, i32
  }
  func.func @transform_7(%arg0: i32, %arg1: i32) -> (i32, i32) {
    %c0_i32 = arith.constant 0 : i32
    %c0_i32_0 = arith.constant 0 : i32
    %c0_i32_1 = arith.constant 0 : i32
    return %c0_i32, %c0_i32_0 : i32, i32
  }
  func.func @transform_8(%arg0: i32, %arg1: i32) -> (i32, i32, i32, i32) {
    %c0_i32 = arith.constant 0 : i32
    %c0_i32_0 = arith.constant 0 : i32
    %c0_i32_1 = arith.constant 0 : i32
    %c0_i32_2 = arith.constant 0 : i32
    return %arg0, %c0_i32, %c0_i32_0, %c0_i32_1 : i32, i32, i32, i32
  }
}

</mosaic_0001>

<bundles_post_ra>
// kernel: ffm_forward.1
= control target key start
LH: loop header
LB: loop body
LE: loop exit
PB: predicated region body
PF: predicated region fallthrough
CT: control target
= control target key end

     0   :  { %s5595_s27 = smov 0   ;;  %s5597_s28 = smov 0   ;;  %s7105_s0 = inlined_call_operand.vmem [shape: bf16[2,18,24,8], index: 0, kind: input, shape index: {}]   ;;  %s7106_s1 = inlined_call_operand.vmem [shape: bf16[9,8,4], index: 1, kind: input, shape index: {}]   ;;  %s7107_s2 = inlined_call_operand.vmem [shape: f32[1,4], index: 2, kind: input, shape index: {}]   ;;  %s7108_s3 = inlined_call_operand.vmem [shape: f32[1,4], index: 3, kind: input, shape index: {}]   ;;  %s7109_s4 = inlined_call_operand.vmem [shape: bf16[4,4], index: 4, kind: input, shape index: {}]   ;;  %s7110_s5 = inlined_call_operand.vmem [shape: f32[1,4], index: 5, kind: input, shape index: {}]   ;;  %s7111_s6 = inlined_call_operand.vmem [shape: bf16[4,4], index: 6, kind: input, shape index: {}]   ;;  %s7112_s7 = inlined_call_operand.vmem [shape: f32[1,4], index: 7, kind: input, shape index: {}]   ;;  %s7113_s8 = inlined_call_operand.vmem [shape: f32[2,16,16,4], index: 8, kind: output, shape index: {}]  }
   0x1   :  { %s5599_s29 = smov 0  }
   0x2 LB: > { %s30_s30 = sadd.s32 1, %s5542_s28  ;;  %p4121_p0 = scmp.ge.s32.totalorder %s5546_s29, 1  ;;  %s5546_s29 = sphi %s5599_s29, %s18_s29   ;;  %s5542_s28 = sphi %s5597_s28, %s7115_s28   ;;  %s5538_s27 = sphi %s5595_s27, %s7114_s27  }
   0x3   : > { %p32_p1 = scmp.ge.s32.totalorder %s30_s30, 2  ;;  %p274_p2 = scmp.lt.s32.totalorder %s5546_s29, 3 }
   0x5   : > { %s7117_s30 = smov (%p32_p1, %s30_s30), 0  ;;  %p275_p3 = pnand %p4121_p0, %p274_p2 }
   0x6   : > { %v4175_v0 = vld [vmem:[%s7106_s1 + $0xc] sm:$0xf] (!%p275_p3)  ;;  %vm629_vm0 = vcmask (!%p275_p3), 1043456   ;;  %p308_p4 = scmp.lt.s32.totalorder (!%p275_p3), %s5538_s27, 1  ;;  %v4272_v2 = vld [vmem:[%s7106_s1 + $0x10] sm:$0xf] (!%p275_p3) }
   0x7   : > { %278 = sbr.rel (%p275_p3) target bundleno = 1196 (0x4ac), region = 52  ;;  %5411 = vmatprep.subr.msk.bf16.mxu0 (!%p275_p3), %vm629_vm0, %v4175_v0  ;;  %5412 = vmatprep.subr.msk.bf16.mxu1 (!%p275_p3), %vm629_vm0, %v4175_v0  ;;  %v631_v1 = vsel (!%p275_p3), %vm629_vm0, %v4175_v0, 0  ;;  %v377_v3 = vld [vmem:[%s7106_s1] sm:$0xf] (!%p275_p3)  ;;  %vm556_vm1 = vcmask (!%p275_p3), 64512   ;;  %v1249_v7 = vsel (!%p275_p3), %vm629_vm0, %v4272_v2, 0 }
   0x8   : > { %4756 = vmatpush3.bf16.msra.mxu0 (!%p275_p3), %v631_v1  ;;  %5218 = vmatpush3.bf16.msra.mxu1 (!%p275_p3), %v631_v1  ;;  %v4125_v8 = vld [vmem:[%s7106_s1 + $0x4] sm:$0xf] (!%p275_p3)  ;;  %v1035_v10 = vsel (!%p275_p3), %vm629_vm0, %v377_v3, 0  ;;  %v4321_v11 = vld [vmem:[%s7106_s1 + $0x14] sm:$0xf] (!%p275_p3)  ;;  %vm324_vm2 = vcmask (!%p275_p3), 24576  }
   0x9   : > { %5414 = vmatprep.subr.msk.bf16.mxu0 (!%p275_p3), %vm629_vm0, %v4272_v2  ;;  %5413 = vmatprep.subr.msk.bf16.mxu1 (!%p275_p3), %vm629_vm0, %v377_v3  ;;  %v1707_v34 = vsel (!%p275_p3), %vm629_vm0, %v4321_v11, 0  ;;  %v5785_v37 = vld [vmem:[%s7106_s1 + $0x8] sm:$0xf] (!%p275_p3)  ;;  %v1477_v39 = vsel (!%p275_p3), %vm629_vm0, %v4125_v8, 0  ;;  %v5810_v42 = vld [vmem:[%s7106_s1 + $0x18] sm:$0xf] (!%p275_p3) }
   0xa   : > { %v1935_v60 = vsel (!%p275_p3), %vm629_vm0, %v5785_v37, 0  ;;  %v5952_v61 = vld [vmem:[%s7106_s1 + $0x20] sm:$0xf] (!%p275_p3)  ;;  %v2409_v62 = vsel (!%p275_p3), %vm629_vm0, %v5810_v42, 0  ;;  %v5977_v63 = vld [vmem:[%s7106_s1 + $0x1c] sm:$0xf] (!%p275_p3) }
   0xb   : > { %vm3835_vm3 = vcmask (!%p275_p3), 1041408   ;;  %vm3449_vm4 = vcmask (!%p275_p3), 1045504   ;;  %vm5549_vm5 = vmmov (!%p275_p3), 0   ;;  %vm3256_vm6 = vcmask (!%p275_p3), 1046528  }
   0xc   : > { %vm3706_vm7 = vcmask (!%p275_p3), 31744  }
   0xe   : > { %s7119_s27 = smov (!%p308_p4, %s5538_s27), 1 }
   0xf   : > { %s5421_s15 = smul.u32 216, %s7119_s27  ;;  %s4525_s19 = sshll.u32 %s7119_s27, 8 }
  0x10   : > { %s6637_s21 = scalar_lea.vmem %s7113_s8, %s4525_s19 }
  0x11   : > { %s5633_s18 = scalar_lea.vmem %s7105_s0, %s5421_s15 }
  0x12   : > { %v5636_v4 = vld [vmem:[%s5633_s18 + $0xc] sm:$0xff]   ;;  %v5639_v5 = vld [vmem:[%s5633_s18 + $0x7c] sm:$0xff]   ;;  %v5644_v6 = vld [vmem:[%s5633_s18 + $0x14] sm:$0xff]  }
  0x13   : > { %4757 = vmatprep.mubr.msk.bf16.mxu0 %vm556_vm1, %v5636_v4  ;;  %4785 = vmatprep.mubr.msk.bf16.mxu1 %vm556_vm1, %v5639_v5  ;;  %v5653_v9 = vld [vmem:[%s5633_s18 + $0x84] sm:$0xff]   ;;  %v5662_v12 = vld [vmem:[%s5633_s18 + $0x1c] sm:$0xff]   ;;  %v5667_v13 = vld [vmem:[%s5633_s18 + $0x8c] sm:$0xff]  }
  0x14   : > { %4758 = vmatmul.mubr.msk.bf16.vlgmr.msra.gmra.mrb[0].mxu0 %vm556_vm1, %v5644_v6  ;;  %4786 = vmatmul.mubr.msk.bf16.vlgmr.msra.gmra.mrb[0].mxu1 %vm556_vm1, %v5653_v9  ;;  %v5674_v14 = vld [vmem:[%s5633_s18 + $0x24] sm:$0xff]   ;;  %v5678_v15 = vld [vmem:[%s5633_s18 + $0x94] sm:$0xff]   ;;  %v5682_v16 = vld [vmem:[%s5633_s18 + $0x2c] sm:$0xff]  }
  0x15   : > { %4856 = vmatpush3.bf16.msra.mxu0 %v1249_v7  ;;  %4761 = vmatprep.mubr.msk.bf16.mxu0 %vm556_vm1, %v5662_v12  ;;  %v5685_v17 = vld [vmem:[%s5633_s18 + $0x9c] sm:$0xff]   ;;  %v5696_v18 = vld [vmem:[%s5633_s18 + $0x34] sm:$0xff]   ;;  %v5699_v19 = vld [vmem:[%s5633_s18 + $0xa4] sm:$0xff]  }
  0x16   : > { %4806 = vmatpush3.bf16.msra.mxu1 %v1035_v10  ;;  %4789 = vmatprep.mubr.msk.bf16.mxu1 %vm556_vm1, %v5667_v13  ;;  %v5702_v20 = vld [vmem:[%s5633_s18 + $0x3c] sm:$0xff]   ;;  %v5705_v21 = vld [vmem:[%s5633_s18 + $0xac] sm:$0xff]   ;;  %v5716_v22 = vld [vmem:[%s5633_s18 + $0x44] sm:$0xff]  }
  0x17   : > { %5415 = vmatprep.subr.msk.bf16.mxu0 %vm629_vm0, %v4125_v8  ;;  %5416 = vmatprep.subr.msk.bf16.mxu1 %vm629_vm0, %v4321_v11  ;;  %v5719_v23 = vld [vmem:[%s5633_s18 + $0xb4] sm:$0xff]   ;;  %v5722_v24 = vld [vmem:[%s5633_s18 + $0x4c] sm:$0xff]   ;;  %v5725_v25 = vld [vmem:[%s5633_s18 + $0xbc] sm:$0xff]  }
  0x18   : > { %v5736_v26 = vld [vmem:[%s5633_s18 + $0x54] sm:$0xff]   ;;  %v5739_v27 = vld [vmem:[%s5633_s18 + $0xc4] sm:$0xff]   ;;  %v5742_v28 = vld [vmem:[%s5633_s18 + $0x5c] sm:$0xff]  }
  0x19   : > { %v5745_v29 = vld [vmem:[%s5633_s18] sm:$0xff]   ;;  %v5759_v31 = vld [vmem:[%s5633_s18 + $0x8] sm:$0xff]   ;;  %v5765_v33 = vld [vmem:[%s5633_s18 + $0x10] sm:$0xff]  }
  0x1a   : > { %v5756_v30 = vld [vmem:[%s5633_s18 + $0x64] sm:$0xff]   ;;  %v5762_v32 = vld [vmem:[%s5633_s18 + $0x6c] sm:$0xff]   ;;  %v5777_v35 = vld [vmem:[%s5633_s18 + $0x74] sm:$0xff]  }
  0x1b   : > { %v5780_v36 = vld [vmem:[%s5633_s18 + $0x18] sm:$0xff]   ;;  %v5788_v38 = vld [vmem:[%s5633_s18 + $0x20] sm:$0xff]   ;;  %v5802_v40 = vld [vmem:[%s5633_s18 + $0x28] sm:$0xff]  }
  0x1c   : > { %4762 = vmatmul.mubr.msk.bf16.gmra.mrb[4].mxu0 %vm556_vm1, %v5674_v14  ;;  %4790 = vmatmul.mubr.msk.bf16.gmra.mrb[4].mxu1 %vm556_vm1, %v5678_v15  ;;  %v5805_v41 = vld [vmem:[%s5633_s18 + $0x30] sm:$0xff]   ;;  %v5823_v43 = vld [vmem:[%s5633_s18 + $0x38] sm:$0xff]   ;;  %v5826_v44 = vld [vmem:[%s5633_s18 + $0x40] sm:$0xff]  }
  0x1d   : > { %4765 = vmatprep.mubr.msk.bf16.mxu0 %vm556_vm1, %v5682_v16  ;;  %4793 = vmatprep.mubr.msk.bf16.mxu1 %vm556_vm1, %v5685_v17  ;;  %v5837_v45 = vld [vmem:[%s5633_s18 + $0x48] sm:$0xff]   ;;  %v5840_v46 = vld [vmem:[%s5633_s18 + $0x50] sm:$0xff]   ;;  %v5851_v47 = vld [vmem:[%s5633_s18 + $0x58] sm:$0xff]  }
  0x1e   : > { %v5854_v48 = vld [vmem:[%s5633_s18 + $0x60] sm:$0xff]   ;;  %v5865_v49 = vld [vmem:[%s5633_s18 + $0x68] sm:$0xff]   ;;  %v5868_v50 = vld [vmem:[%s5633_s18 + $0x70] sm:$0xff]  }
  0x1f   : > { %v5879_v51 = vld [vmem:[%s5633_s18 + $0x78] sm:$0xff]   ;;  %v5882_v52 = vld [vmem:[%s5633_s18 + $0x80] sm:$0xff]   ;;  %v5893_v53 = vld [vmem:[%s5633_s18 + $0x88] sm:$0xff]  }
  0x20   : > { %v5896_v54 = vld [vmem:[%s5633_s18 + $0x90] sm:$0xff]   ;;  %v5907_v55 = vld [vmem:[%s5633_s18 + $0x98] sm:$0xff]   ;;  %v5910_v56 = vld [vmem:[%s5633_s18 + $0xa0] sm:$0xff]  }
  0x21   : > { %v5921_v57 = vld [vmem:[%s5633_s18 + $0xa8] sm:$0xff]   ;;  %v5924_v58 = vld [vmem:[%s5633_s18 + $0xb0] sm:$0xff]   ;;  %v5935_v59 = vld [vmem:[%s5633_s18 + $0xb8] sm:$0xff]  }
  0x24   : > { %4766 = vmatmul.mubr.msk.bf16.gmra.mrb[8].mxu0 %vm556_vm1, %v5696_v18  ;;  %4794 = vmatmul.mubr.msk.bf16.gmra.mrb[8].mxu1 %vm556_vm1, %v5699_v19 }
  0x25   : > { %4769 = vmatprep.mubr.msk.bf16.mxu0 %vm556_vm1, %v5702_v20  ;;  %4797 = vmatprep.mubr.msk.bf16.mxu1 %vm556_vm1, %v5705_v21 }
  0x2c   : > { %4770 = vmatmul.mubr.msk.bf16.gmra.mrb[12].mxu0 %vm556_vm1, %v5716_v22  ;;  %4798 = vmatmul.mubr.msk.bf16.gmra.mrb[12].mxu1 %vm556_vm1, %v5719_v23 }
  0x2d   : > { %4773 = vmatprep.mubr.msk.bf16.mxu0 %vm556_vm1, %v5722_v24  ;;  %4801 = vmatprep.mubr.msk.bf16.mxu1 %vm556_vm1, %v5725_v25 }
  0x34   : > { %4774 = vmatmul.mubr.msk.bf16.gmra.mrb[16].mxu0 %vm556_vm1, %v5736_v26  ;;  %4802 = vmatmul.mubr.msk.bf16.gmra.mrb[16].mxu1 %vm556_vm1, %v5739_v27 }
  0x35   : > { %4777 = vmatprep.mubr.msk.bf16.mxu0 %vm556_vm1, %v5742_v28  ;;  %4807 = vmatprep.mubr.msk.bf16.mxu1 %vm556_vm1, %v5745_v29 }
  0x3c   : > { %4778 = vmatmul.mubr.msk.bf16.gmra.mrb[20].mxu0 %vm556_vm1, %v5756_v30  ;;  %4808 = vmatmul.mubr.msk.bf16.vlgmr.msra.gmra.mrb[20].mxu1 %vm556_vm1, %v5759_v31 }
  0x3d   : > { %4781 = vmatprep.mubr.msk.bf16.mxu0 %vm556_vm1, %v5762_v32  ;;  %4811 = vmatprep.mubr.msk.bf16.mxu1 %vm556_vm1, %v5765_v33 }
  0x3e   : > { %4956 = vmatpush3.bf16.msra.mxu1 %v1707_v34 }
  0x3f   : > { %5417 = vmatprep.subr.msk.bf16.mxu1 %vm629_vm0, %v5785_v37 }
  0x44   : > { %4782 = vmatmul.mubr.msk.bf16.gmra.mrb[24].mxu0 %vm556_vm1, %v5777_v35  ;;  %4812 = vmatmul.mubr.msk.bf16.gmra.mrb[24].mxu1 %vm556_vm1, %v5780_v36 }
  0x45   : > { %4857 = vmatprep.mubr.msk.bf16.mxu0 %vm556_vm1, %v5636_v4  ;;  %4815 = vmatprep.mubr.msk.bf16.mxu1 %vm556_vm1, %v5788_v38 }
  0x4c   : > { %4858 = vmatmul.mubr.msk.bf16.vlgmr.msra.gmra.mrb[28].mxu0 %vm556_vm1, %v5644_v6  ;;  %4816 = vmatmul.mubr.msk.bf16.gmra.mrb[28].mxu1 %vm556_vm1, %v5802_v40 }
  0x4d   : > { %4906 = vmatpush3.bf16.msra.mxu0 %v1477_v39  ;;  %4819 = vmatprep.mubr.msk.bf16.mxu1 %vm556_vm1, %v5805_v41  ;;  %v6131_v39 = vld [vmem:[%s5633_s18 + $0x20] sm:$0xff]  }
  0x4e   : > { %4861 = vmatprep.mubr.msk.bf16.mxu0 %vm556_vm1, %v5662_v12  ;;  %5418 = vmatprep.subr.msk.bf16.mxu0 %vm629_vm0, %v5810_v42 }
  0x54   : > { %4862 = vmatmul.mubr.msk.bf16.gmra.mrb[32].mxu0 %vm556_vm1, %v5674_v14  ;;  %4820 = vmatmul.mubr.msk.bf16.gmra.mrb[32].mxu1 %vm556_vm1, %v5823_v43 }
  0x55   : > { %4865 = vmatprep.mubr.msk.bf16.mxu0 %vm556_vm1, %v5682_v16  ;;  %4823 = vmatprep.mubr.msk.bf16.mxu1 %vm556_vm1, %v5826_v44 }
  0x5c   : > { %4866 = vmatmul.mubr.msk.bf16.gmra.mrb[36].mxu0 %vm556_vm1, %v5696_v18  ;;  %4824 = vmatmul.mubr.msk.bf16.gmra.mrb[36].mxu1 %vm556_vm1, %v5837_v45 }
  0x5d   : > { %4869 = vmatprep.mubr.msk.bf16.mxu0 %vm556_vm1, %v5702_v20  ;;  %4827 = vmatprep.mubr.msk.bf16.mxu1 %vm556_vm1, %v5840_v46 }
  0x64   : > { %4870 = vmatmul.mubr.msk.bf16.gmra.mrb[40].mxu0 %vm556_vm1, %v5716_v22  ;;  %4828 = vmatmul.mubr.msk.bf16.gmra.mrb[40].mxu1 %vm556_vm1, %v5851_v47 }
  0x65   : > { %4873 = vmatprep.mubr.msk.bf16.mxu0 %vm556_vm1, %v5722_v24  ;;  %4831 = vmatprep.mubr.msk.bf16.mxu1 %vm556_vm1, %v5854_v48 }
  0x6c   : > { %4874 = vmatmul.mubr.msk.bf16.gmra.mrb[44].mxu0 %vm556_vm1, %v5736_v26  ;;  %4832 = vmatmul.mubr.msk.bf16.gmra.mrb[44].mxu1 %vm556_vm1, %v5865_v49 }
  0x6d   : > { %4877 = vmatprep.mubr.msk.bf16.mxu0 %vm556_vm1, %v5742_v28  ;;  %4835 = vmatprep.mubr.msk.bf16.mxu1 %vm556_vm1, %v5868_v50 }
  0x74   : > { %4878 = vmatmul.mubr.msk.bf16.gmra.mrb[48].mxu0 %vm556_vm1, %v5756_v30  ;;  %4836 = vmatmul.mubr.msk.bf16.gmra.mrb[48].mxu1 %vm556_vm1, %v5879_v51 }
  0x75   : > { %4881 = vmatprep.mubr.msk.bf16.mxu0 %vm556_vm1, %v5762_v32  ;;  %4839 = vmatprep.mubr.msk.bf16.mxu1 %vm556_vm1, %v5882_v52 }
  0x7c   : > { %4882 = vmatmul.mubr.msk.bf16.gmra.mrb[52].mxu0 %vm556_vm1, %v5777_v35  ;;  %4840 = vmatmul.mubr.msk.bf16.gmra.mrb[52].mxu1 %vm556_vm1, %v5893_v53 }
  0x7d   : > { %4885 = vmatprep.mubr.msk.bf16.mxu0 %vm556_vm1, %v5639_v5  ;;  %4843 = vmatprep.mubr.msk.bf16.mxu1 %vm556_vm1, %v5896_v54 }
  0x84   : > { %4886 = vmatmul.mubr.msk.bf16.gmra.mrb[56].mxu0 %vm556_vm1, %v5653_v9  ;;  %4844 = vmatmul.mubr.msk.bf16.gmra.mrb[56].mxu1 %vm556_vm1, %v5907_v55 }
  0x85   : > { %4889 = vmatprep.mubr.msk.bf16.mxu0 %vm556_vm1, %v5667_v13  ;;  %4847 = vmatprep.mubr.msk.bf16.mxu1 %vm556_vm1, %v5910_v56 }
  0x8c   : > { %4890 = vmatmul.mubr.msk.bf16.gmra.mrb[60].mxu0 %vm556_vm1, %v5678_v15  ;;  %4848 = vmatmul.mubr.msk.bf16.gmra.mrb[60].mxu1 %vm556_vm1, %v5921_v57 }
  0x8d   : > { %4893 = vmatprep.mubr.msk.bf16.mxu0 %vm556_vm1, %v5685_v17  ;;  %4851 = vmatprep.mubr.msk.bf16.mxu1 %vm556_vm1, %v5924_v58 }
  0x94   : > { %4894 = vmatmul.mubr.msk.bf16.gmra.mrb[64].mxu0 %vm556_vm1, %v5699_v19  ;;  %4852 = vmatmul.mubr.msk.bf16.gmra.mrb[64].mxu1 %vm556_vm1, %v5935_v59 }
  0x95   : > { %4897 = vmatprep.mubr.msk.bf16.mxu0 %vm556_vm1, %v5705_v21  ;;  %4957 = vmatprep.mubr.msk.bf16.mxu1 %vm556_vm1, %v5636_v4 }
  0x9c   : > { %4898 = vmatmul.mubr.msk.bf16.gmra.mrb[68].mxu0 %vm556_vm1, %v5719_v23  ;;  %4958 = vmatmul.mubr.msk.bf16.vlgmr.msra.gmra.mrb[68].mxu1 %vm556_vm1, %v5644_v6 }
  0x9d   : > { %4901 = vmatprep.mubr.msk.bf16.mxu0 %vm556_vm1, %v5725_v25  ;;  %4961 = vmatprep.mubr.msk.bf16.mxu1 %vm556_vm1, %v5662_v12 }
  0x9e   : > { %5006 = vmatpush3.bf16.msra.mxu1 %v1935_v60 }
  0x9f   : > { %5420 = vmatprep.subr.msk.bf16.mxu1 %vm629_vm0, %v5952_v61 }
  0xa4   : > { %4902 = vmatmul.mubr.msk.bf16.gmra.mrb[72].mxu0 %vm556_vm1, %v5739_v27  ;;  %4962 = vmatmul.mubr.msk.bf16.gmra.mrb[72].mxu1 %vm556_vm1, %v5674_v14 }
  0xa5   : > { %4907 = vmatprep.mubr.msk.bf16.mxu0 %vm556_vm1, %v5745_v29  ;;  %4965 = vmatprep.mubr.msk.bf16.mxu1 %vm556_vm1, %v5682_v16 }
  0xac   : > { %4908 = vmatmul.mubr.msk.bf16.vlgmr.msra.gmra.mrb[28].mxu0 %vm556_vm1, %v5759_v31  ;;  %4966 = vmatmul.mubr.msk.bf16.gmra.mrb[76].mxu1 %vm556_vm1, %v5696_v18 }
  0xad   : > { %5056 = vmatpush3.bf16.msra.mxu0 %v2409_v62  ;;  %4911 = vmatprep.mubr.msk.bf16.mxu0 %vm556_vm1, %v5765_v33 }
  0xae   : > { %4969 = vmatprep.mubr.msk.bf16.mxu1 %vm556_vm1, %v5702_v20  ;;  %5419 = vmatprep.subr.msk.bf16.mxu0 %vm629_vm0, %v5977_v63 }
  0xb4   : > { %4912 = vmatmul.mubr.msk.bf16.gmra.mrb[32].mxu0 %vm556_vm1, %v5780_v36  ;;  %4970 = vmatmul.mubr.msk.bf16.gmra.mrb[80].mxu1 %vm556_vm1, %v5716_v22 }
  0xb5   : > { %4915 = vmatprep.mubr.msk.bf16.mxu0 %vm556_vm1, %v5788_v38  ;;  %4973 = vmatprep.mubr.msk.bf16.mxu1 %vm556_vm1, %v5722_v24  ;;  %v2933_v24 = vsel %vm629_vm0, %v5952_v61, 0 }
  0xbc   : > { %4916 = vmatmul.mubr.msk.bf16.gmra.mrb[36].mxu0 %vm556_vm1, %v5802_v40  ;;  %4974 = vmatmul.mubr.msk.bf16.gmra.mrb[84].mxu1 %vm556_vm1, %v5736_v26 }
  0xbd   : > { %4919 = vmatprep.mubr.msk.bf16.mxu0 %vm556_vm1, %v5805_v41  ;;  %4977 = vmatprep.mubr.msk.bf16.mxu1 %vm556_vm1, %v5742_v28 }
  0xc4   : > { %4920 = vmatmul.mubr.msk.bf16.gmra.mrb[40].mxu0 %vm556_vm1, %v5823_v43  ;;  %4978 = vmatmul.mubr.msk.bf16.gmra.mrb[88].mxu1 %vm556_vm1, %v5756_v30  ;;  %v6110_v30 = vld [vmem:[%s5633_s18 + $0x18] sm:$0xff]  }
  0xc5   : > { %4923 = vmatprep.mubr.msk.bf16.mxu0 %vm556_vm1, %v5826_v44  ;;  %4981 = vmatprep.mubr.msk.bf16.mxu1 %vm556_vm1, %v5762_v32 }
  0xcc   : > { %4924 = vmatmul.mubr.msk.bf16.gmra.mrb[44].mxu0 %vm556_vm1, %v5837_v45  ;;  %4982 = vmatmul.mubr.msk.bf16.gmra.mrb[92].mxu1 %vm556_vm1, %v5777_v35 }
  0xcd   : > { %4927 = vmatprep.mubr.msk.bf16.mxu0 %vm556_vm1, %v5840_v46  ;;  %4985 = vmatprep.mubr.msk.bf16.mxu1 %vm556_vm1, %v5639_v5 }
  0xd4   : > { %4928 = vmatmul.mubr.msk.bf16.gmra.mrb[48].mxu0 %vm556_vm1, %v5851_v47  ;;  %4986 = vmatmul.mubr.msk.bf16.gmra.mrb[96].mxu1 %vm556_vm1, %v5653_v9 }
  0xd5   : > { %4931 = vmatprep.mubr.msk.bf16.mxu0 %vm556_vm1, %v5854_v48  ;;  %4989 = vmatprep.mubr.msk.bf16.mxu1 %vm556_vm1, %v5667_v13 }
  0xdc   : > { %4932 = vmatmul.mubr.msk.bf16.gmra.mrb[52].mxu0 %vm556_vm1, %v5865_v49  ;;  %4990 = vmatmul.mubr.msk.bf16.gmra.mrb[100].mxu1 %vm556_vm1, %v5678_v15 }
  0xdd   : > { %4935 = vmatprep.mubr.msk.bf16.mxu0 %vm556_vm1, %v5868_v50  ;;  %4993 = vmatprep.mubr.msk.bf16.mxu1 %vm556_vm1, %v5685_v17 }
  0xe4   : > { %4936 = vmatmul.mubr.msk.bf16.gmra.mrb[56].mxu0 %vm556_vm1, %v5879_v51  ;;  %4994 = vmatmul.mubr.msk.bf16.gmra.mrb[104].mxu1 %vm556_vm1, %v5699_v19 }
  0xe5   : > { %4939 = vmatprep.mubr.msk.bf16.mxu0 %vm556_vm1, %v5882_v52  ;;  %4997 = vmatprep.mubr.msk.bf16.mxu1 %vm556_vm1, %v5705_v21 }
  0xe7   : > { %v4759_v0 = vpop.f32.mrb[0].mxu0  ;;  %v6045_v2 = vpop.f32.mrb[0].mxu1 }
  0xe8   : > { %v6043_v1 = vpop.f32.mrb[1].mxu0  ;;  %v6049_v4 = vpop.f32.mrb[1].mxu1  ;;  %v6138_v0 = vld [vmem:[%s5633_s18 + $0x28] sm:$0xff]  }
  0xe9   : > { %v6047_v3 = vpop.f32.mrb[2].mxu0  ;;  %v6053_v6 = vpop.f32.mrb[2].mxu1 }
  0xea   : > { %v6051_v5 = vpop.f32.mrb[3].mxu0  ;;  %v773_v7 = vpop.f32.mrb[3].mxu1 }
  0xec   : > { %4940 = vmatmul.mubr.msk.bf16.gmra.mrb[60].mxu0 %vm556_vm1, %v5893_v53  ;;  %4998 = vmatmul.mubr.msk.bf16.gmra.mrb[108].mxu1 %vm556_vm1, %v5719_v23 }
  0xed   : > { %4943 = vmatprep.mubr.msk.bf16.mxu0 %vm556_vm1, %v5896_v54  ;;  %5001 = vmatprep.mubr.msk.bf16.mxu1 %vm556_vm1, %v5725_v25 }
  0xef   : > { %v6063_v8 = vpop.f32.mrb[4].mxu0  ;;  %v6067_v10 = vpop.f32.mrb[4].mxu1 }
  0xf0   : > { %v6065_v9 = vpop.f32.mrb[5].mxu0  ;;  %v785_v12 = vpop.f32.mrb[5].mxu1 }
  0xf1   : > { %v6069_v11 = vpop.f32.mrb[6].mxu0  ;;  %v4792_v14 = vpop.f32.mrb[6].mxu1 }
  0xf2   : > { %v685_v13 = vpop.f32.mrb[7].mxu0  ;;  %v6071_v15 = vpop.f32.mrb[7].mxu1 }
  0xf3   : > { %v6153_v13 = vld [vmem:[%s5633_s18 + $0x30] sm:$0xff]  }
  0xf4   : > { %4944 = vmatmul.mubr.msk.bf16.gmra.mrb[64].mxu0 %vm556_vm1, %v5907_v55  ;;  %5002 = vmatmul.mubr.msk.bf16.gmra.mrb[112].mxu1 %vm556_vm1, %v5739_v27 }
  0xf5   : > { %4947 = vmatprep.mubr.msk.bf16.mxu0 %vm556_vm1, %v5910_v56  ;;  %5007 = vmatprep.mubr.msk.bf16.mxu1 %vm556_vm1, %v5745_v29 }
  0xf7   : > { %v6081_v16 = vpop.f32.mrb[8].mxu0  ;;  %v4795_v18 = vpop.f32.mrb[8].mxu1 }
  0xf8   : > { %v697_v17 = vpop.f32.mrb[9].mxu0  ;;  %v6083_v20 = vpop.f32.mrb[9].mxu1  ;;  %v6156_v18 = vld [vmem:[%s5633_s18 + $0x38] sm:$0xff]  }
  0xf9   : > { %v4768_v19 = vpop.f32.mrb[10].mxu0  ;;  %v6087_v22 = vpop.f32.mrb[10].mxu1 }
  0xfa   : > { %v6085_v21 = vpop.f32.mrb[11].mxu0  ;;  %v6089_v23 = vpop.f32.mrb[11].mxu1 }
  0xfc   : > { %4948 = vmatmul.mubr.msk.bf16.gmra.mrb[68].mxu0 %vm556_vm1, %v5921_v57  ;;  %5008 = vmatmul.mubr.msk.bf16.vlgmr.msra.gmra.mrb[68].mxu1 %vm556_vm1, %v5759_v31 }
  0xfd   : > { %4951 = vmatprep.mubr.msk.bf16.mxu0 %vm556_vm1, %v5924_v58  ;;  %5011 = vmatprep.mubr.msk.bf16.mxu1 %vm556_vm1, %v5765_v33 }
  0xfe   : > { %5156 = vmatpush3.bf16.msra.mxu1 %v2933_v24 }
  0xff   : > { %v4771_v25 = vpop.f32.mrb[12].mxu0  ;;  %v6103_v27 = vpop.f32.mrb[12].mxu1 }
 0x100   : > { %v6101_v26 = vpop.f32.mrb[13].mxu0  ;;  %v6107_v29 = vpop.f32.mrb[13].mxu1 }
 0x101   : > { %v6105_v28 = vpop.f32.mrb[14].mxu0  ;;  %v6114_v32 = vpop.f32.mrb[14].mxu1 }
 0x102   : > { %v6112_v31 = vpop.f32.mrb[15].mxu0  ;;  %v817_v34 = vpop.f32.mrb[15].mxu1 }
 0x104   : > { %4952 = vmatmul.mubr.msk.bf16.gmra.mrb[72].mxu0 %vm556_vm1, %v5935_v59  ;;  %5012 = vmatmul.mubr.msk.bf16.gmra.mrb[72].mxu1 %vm556_vm1, %v5780_v36  ;;  %v2655_v36 = vsel %vm629_vm0, %v5977_v63, 0 }
 0x105   : > { %5057 = vmatprep.mubr.msk.bf16.mxu0 %vm556_vm1, %v6110_v30  ;;  %5015 = vmatprep.mubr.msk.bf16.mxu1 %vm556_vm1, %v5788_v38 }
 0x107   : > { %v6124_v33 = vpop.f32.mrb[16].mxu0  ;;  %v6128_v37 = vpop.f32.mrb[16].mxu1 }
 0x108   : > { %v6126_v35 = vpop.f32.mrb[17].mxu0  ;;  %v829_v60 = vpop.f32.mrb[17].mxu1 }
 0x109   : > { %v6133_v42 = vpop.f32.mrb[18].mxu0  ;;  %v4804_v62 = vpop.f32.mrb[18].mxu1 }
 0x10a   : > { %v729_v61 = vpop.f32.mrb[19].mxu0  ;;  %v6140_v38 = vpop.f32.mrb[19].mxu1 }
 0x10b   : > { %v6180_v61 = vld [vmem:[%s5633_s18 + $0x40] sm:$0xff]  }
 0x10c   : > { %5058 = vmatmul.mubr.msk.bf16.vlgmr.msra.gmra.mrb[76].mxu0 %vm556_vm1, %v6131_v39  ;;  %5016 = vmatmul.mubr.msk.bf16.gmra.mrb[76].mxu1 %vm556_vm1, %v5802_v40 }
 0x10d   : > { %5106 = vmatpush3.bf16.msra.mxu0 %v2655_v36  ;;  %5019 = vmatprep.mubr.msk.bf16.mxu1 %vm556_vm1, %v5805_v41 }
 0x10e   : > { %5061 = vmatprep.mubr.msk.bf16.mxu0 %vm556_vm1, %v6138_v0 }
 0x10f   : > { %v6150_v7 = vpop.f32.mrb[20].mxu0  ;;  %v4809_v63 = vpop.f32.mrb[20].mxu1 }
 0x110   : > { %v741_v12 = vpop.f32.mrb[21].mxu0  ;;  %v1071_v14 = vpop.f32.mrb[21].mxu1 }
 0x111   : > { %v4780_v17 = vpop.f32.mrb[22].mxu0  ;;  %v6159_v40 = vadd.f32 %v1071_v14, %v6043_v1  ;;  %v4810_v19 = vpop.f32.mrb[22].mxu1 }
 0x112   : > { %v6161_v41 = vpop.f32.mrb[23].mxu0  ;;  %v6164_v24 = vadd.f32 %v4810_v19, %v6047_v3  ;;  %v1074_v25 = vpop.f32.mrb[23].mxu1 }
 0x113   : > { %v6167_v34 = vadd.f32 %v1074_v25, %v6051_v5  ;;  %v6213_v25 = vld [vmem:[%s5633_s18 + $0x58] sm:$0xff]  }
 0x114   : > { %5062 = vmatmul.mubr.msk.bf16.gmra.mrb[80].mxu0 %vm556_vm1, %v6153_v13  ;;  %5020 = vmatmul.mubr.msk.bf16.gmra.mrb[80].mxu1 %vm556_vm1, %v5823_v43  ;;  %v6188_v43 = vld [vmem:[%s5633_s18 + $0x48] sm:$0xff]  }
 0x115   : > { %5065 = vmatprep.mubr.msk.bf16.mxu0 %vm556_vm1, %v6156_v18  ;;  %5023 = vmatprep.mubr.msk.bf16.mxu1 %vm556_vm1, %v5826_v44 }
 0x117   : > { %v4783_v1 = vpop.f32.mrb[24].mxu0  ;;  %v4813_v60 = vpop.f32.mrb[24].mxu1 }
 0x118   : > { %v6177_v3 = vpop.f32.mrb[25].mxu0  ;;  %v6183_v5 = vadd.f32 %v4813_v60, %v6063_v8  ;;  %v1086_v36 = vpop.f32.mrb[25].mxu1 }
 0x119   : > { %v6185_v62 = vpop.f32.mrb[26].mxu0  ;;  %v6191_v63 = vadd.f32 %v1086_v36, %v6065_v9  ;;  %v4814_v44 = vpop.f32.mrb[26].mxu1  ;;  %v6207_v9 = vld [vmem:[%s5633_s18 + $0x50] sm:$0xff]  }
 0x11a   : > { %v6193_v12 = vpop.f32.mrb[27].mxu0  ;;  %v6196_v14 = vadd.f32 %v4814_v44, %v6069_v11  ;;  %v1089_v17 = vpop.f32.mrb[27].mxu1 }
 0x11c   : > { %5066 = vmatmul.mubr.msk.bf16.gmra.mrb[84].mxu0 %vm556_vm1, %v6180_v61  ;;  %5024 = vmatmul.mubr.msk.bf16.gmra.mrb[84].mxu1 %vm556_vm1, %v5837_v45 }
 0x11d   : > { %5069 = vmatprep.mubr.msk.bf16.mxu0 %vm556_vm1, %v6188_v43  ;;  %5027 = vmatprep.mubr.msk.bf16.mxu1 %vm556_vm1, %v5840_v46 }
 0x11f   : > { %v4817_v8 = vpop.f32.mrb[28].mxu1 }
 0x120   : > { %v6210_v11 = vadd.f32 %v4817_v8, %v6081_v16  ;;  %v1101_v19 = vpop.f32.mrb[29].mxu1  ;;  %v6227_v16 = vld [vmem:[%s5633_s18 + $0x60] sm:$0xff]  }
 0x121   : > { %v4818_v1 = vpop.f32.mrb[30].mxu1 }
 0x122   : > { %v1103_v60 = vpop.f32.mrb[31].mxu1  ;;  %v6256_v1 = vld [vmem:[%s5633_s18 + $0x78] sm:$0xff]  }
 0x123   : > { %v6216_v45 = vadd.f32 %v1103_v60, %v6085_v21  ;;  %v6230_v21 = vld [vmem:[%s5633_s18 + $0x68] sm:$0xff]  }
 0x124   : > { %5070 = vmatmul.mubr.msk.bf16.gmra.mrb[88].mxu0 %vm556_vm1, %v6207_v9  ;;  %5028 = vmatmul.mubr.msk.bf16.gmra.mrb[88].mxu1 %vm556_vm1, %v5851_v47 }
 0x125   : > { %5073 = vmatprep.mubr.msk.bf16.mxu0 %vm556_vm1, %v6213_v25  ;;  %5031 = vmatprep.mubr.msk.bf16.mxu1 %vm556_vm1, %v5854_v48 }
 0x127   : > { %v4821_v46 = vpop.f32.mrb[32].mxu1 }
 0x128   : > { %v1115_v36 = vpop.f32.mrb[33].mxu1 }
 0x129   : > { %v6233_v44 = vadd.f32 %v1115_v36, %v6101_v26  ;;  %v4822_v17 = vpop.f32.mrb[34].mxu1  ;;  %v6250_v26 = vld [vmem:[%s5633_s18 + $0x70] sm:$0xff]  }
 0x12a   : > { %v6236_v47 = vadd.f32 %v4822_v17, %v6105_v28  ;;  %v1118_v8 = vpop.f32.mrb[35].mxu1  ;;  %v6279_v17 = vld [vmem:[%s5633_s18 + $0x88] sm:$0xff]  }
 0x12b   : > { %v6239_v19 = vadd.f32 %v1118_v8, %v6112_v31 }
 0x12c   : > { %5074 = vmatmul.mubr.msk.bf16.gmra.mrb[92].mxu0 %vm556_vm1, %v6227_v16  ;;  %5032 = vmatmul.mubr.msk.bf16.gmra.mrb[92].mxu1 %vm556_vm1, %v5865_v49 }
 0x12d   : > { %5077 = vmatprep.mubr.msk.bf16.mxu0 %vm556_vm1, %v6230_v21  ;;  %5035 = vmatprep.mubr.msk.bf16.mxu1 %vm556_vm1, %v5868_v50 }
 0x12f   : > { %v4825_v48 = vpop.f32.mrb[36].mxu1 }
 0x130   : > { %v6253_v28 = vadd.f32 %v4825_v48, %v6124_v33  ;;  %v1130_v31 = vpop.f32.mrb[37].mxu1  ;;  %v6273_v33 = vld [vmem:[%s5633_s18 + $0x80] sm:$0xff]  }
 0x131   : > { %v6259_v60 = vadd.f32 %v1130_v31, %v6126_v35  ;;  %v4826_v49 = vpop.f32.mrb[38].mxu1 }
 0x132   : > { %v6262_v46 = vadd.f32 %v4826_v49, %v6133_v42  ;;  %v1133_v36 = vpop.f32.mrb[39].mxu1 }
 0x134   : > { %5078 = vmatmul.mubr.msk.bf16.gmra.mrb[96].mxu0 %vm556_vm1, %v6250_v26  ;;  %5036 = vmatmul.mubr.msk.bf16.gmra.mrb[96].mxu1 %vm556_vm1, %v5879_v51 }
 0x135   : > { %5081 = vmatprep.mubr.msk.bf16.mxu0 %vm556_vm1, %v6256_v1  ;;  %5039 = vmatprep.mubr.msk.bf16.mxu1 %vm556_vm1, %v5882_v52 }
 0x137   : > { %v4829_v50 = vpop.f32.mrb[40].mxu1 }
 0x138   : > { %v6276_v35 = vadd.f32 %v4829_v50, %v6150_v7  ;;  %v1145_v42 = vpop.f32.mrb[41].mxu1  ;;  %v6293_v7 = vld [vmem:[%s5633_s18 + $0x90] sm:$0xff]  }
 0x139   : > { %v4830_v8 = vpop.f32.mrb[42].mxu1 }
 0x13a   : > { %v1147_v48 = vpop.f32.mrb[43].mxu1  ;;  %v6322_v8 = vld [vmem:[%s5633_s18 + $0xa8] sm:$0xff]  }
 0x13b   : > { %v6282_v51 = vadd.f32 %v1147_v48, %v6161_v41  ;;  %v6296_v41 = vld [vmem:[%s5633_s18 + $0x98] sm:$0xff]  }
 0x13c   : > { %5082 = vmatmul.mubr.msk.bf16.gmra.mrb[100].mxu0 %vm556_vm1, %v6273_v33  ;;  %5040 = vmatmul.mubr.msk.bf16.gmra.mrb[100].mxu1 %vm556_vm1, %v5893_v53 }
 0x13d   : > { %5085 = vmatprep.mubr.msk.bf16.mxu0 %vm556_vm1, %v6279_v17  ;;  %5043 = vmatprep.mubr.msk.bf16.mxu1 %vm556_vm1, %v5896_v54 }
 0x13f   : > { %v4833_v52 = vpop.f32.mrb[44].mxu1 }
 0x140   : > { %v1159_v31 = vpop.f32.mrb[45].mxu1 }
 0x141   : > { %v6299_v49 = vadd.f32 %v1159_v31, %v6177_v3  ;;  %v4834_v36 = vpop.f32.mrb[46].mxu1  ;;  %v6316_v3 = vld [vmem:[%s5633_s18 + $0xa0] sm:$0xff]  }
 0x142   : > { %v6302_v53 = vadd.f32 %v4834_v36, %v6185_v62  ;;  %v1162_v50 = vpop.f32.mrb[47].mxu1  ;;  %v6345_v36 = vld [vmem:[%s5633_s18 + $0xb8] sm:$0xff]  }
 0x143   : > { %v6305_v42 = vadd.f32 %v1162_v50, %v6193_v12 }
 0x144   : > { %5086 = vmatmul.mubr.msk.bf16.gmra.mrb[104].mxu0 %vm556_vm1, %v6293_v7  ;;  %5044 = vmatmul.mubr.msk.bf16.gmra.mrb[104].mxu1 %vm556_vm1, %v5907_v55 }
 0x145   : > { %5089 = vmatprep.mubr.msk.bf16.mxu0 %vm556_vm1, %v6296_v41  ;;  %5047 = vmatprep.mubr.msk.bf16.mxu1 %vm556_vm1, %v5910_v56 }
 0x147   : > { %v4837_v54 = vpop.f32.mrb[48].mxu1 }
 0x148   : > { %v6319_v62 = vadd.f32 %v4837_v54, %v6045_v2  ;;  %v1174_v12 = vpop.f32.mrb[49].mxu1  ;;  %v6339_v2 = vld [vmem:[%s5633_s18 + $0xb0] sm:$0xff]  }
 0x149   : > { %v6325_v48 = vadd.f32 %v1174_v12, %v6049_v4  ;;  %v4838_v55 = vpop.f32.mrb[50].mxu1 }
 0x14a   : > { %v6328_v52 = vadd.f32 %v4838_v55, %v6053_v6  ;;  %v1177_v31 = vpop.f32.mrb[51].mxu1  ;;  %v6362_v55 = vld [vmem:[%s5633_s18 + $0xc8] sm:$0xff]  }
 0x14c   : > { %5090 = vmatmul.mubr.msk.bf16.gmra.mrb[108].mxu0 %vm556_vm1, %v6316_v3  ;;  %5048 = vmatmul.mubr.msk.bf16.gmra.mrb[108].mxu1 %vm556_vm1, %v5921_v57 }
 0x14d   : > { %5093 = vmatprep.mubr.msk.bf16.mxu0 %vm556_vm1, %v6322_v8  ;;  %5051 = vmatprep.mubr.msk.bf16.mxu1 %vm556_vm1, %v5924_v58 }
 0x14f   : > { %v4841_v56 = vpop.f32.mrb[52].mxu1 }
 0x150   : > { %v6342_v4 = vadd.f32 %v4841_v56, %v6067_v10  ;;  %v1189_v6 = vpop.f32.mrb[53].mxu1  ;;  %v6359_v10 = vld [vmem:[%s5633_s18 + $0xc0] sm:$0xff]  }
 0x151   : > { %v4842_v50 = vpop.f32.mrb[54].mxu1 }
 0x152   : > { %v1191_v54 = vpop.f32.mrb[55].mxu1  ;;  %v5519_v50 = vld [vmem:[%s5633_s18 + $0xd0] sm:$0xff]  }
 0x153   : > { %v6348_v57 = vadd.f32 %v1191_v54, %v6071_v15 }
 0x154   : > { %5094 = vmatmul.mubr.msk.bf16.gmra.mrb[112].mxu0 %vm556_vm1, %v6339_v2  ;;  %5052 = vmatmul.mubr.msk.bf16.gmra.mrb[112].mxu1 %vm556_vm1, %v5935_v59 }
 0x155   : > { %5097 = vmatprep.mubr.msk.bf16.mxu0 %vm556_vm1, %v6345_v36  ;;  %5157 = vmatprep.mubr.msk.bf16.mxu1 %vm556_vm1, %v6110_v30 }
 0x157   : > { %v4845_v58 = vpop.f32.mrb[56].mxu1 }
 0x158   : > { %v1203_v12 = vpop.f32.mrb[57].mxu1 }
 0x159   : > { %v6365_v15 = vadd.f32 %v1203_v12, %v6083_v20  ;;  %v4846_v31 = vpop.f32.mrb[58].mxu1 }
 0x15a   : > { %v6368_v56 = vadd.f32 %v4846_v31, %v6087_v22  ;;  %v1206_v59 = vpop.f32.mrb[59].mxu1 }
 0x15b   : > { %v6371_v6 = vadd.f32 %v1206_v59, %v6089_v23 }
 0x15c   : > { %5098 = vmatmul.mubr.msk.bf16.gmra.mrb[116].mxu0 %vm556_vm1, %v6359_v10  ;;  %5158 = vmatmul.mubr.msk.bf16.vlgmr.msra.gmra.mrb[68].mxu1 %vm556_vm1, %v6131_v39 }
 0x15d   : > { %5101 = vmatprep.mubr.msk.bf16.mxu0 %vm556_vm1, %v6362_v55  ;;  %5161 = vmatprep.mubr.msk.bf16.mxu1 %vm556_vm1, %v6138_v0 }
 0x15f   : > { %v4849_v20 = vpop.f32.mrb[60].mxu1 }
 0x160   : > { %v6383_v22 = vadd.f32 %v4849_v20, %v6103_v27  ;;  %v1218_v54 = vpop.f32.mrb[61].mxu1 }
 0x161   : > { %v6386_v23 = vadd.f32 %v1218_v54, %v6107_v29  ;;  %v4850_v58 = vpop.f32.mrb[62].mxu1 }
 0x162   : > { %v6389_v12 = vadd.f32 %v4850_v58, %v6114_v32  ;;  %v1221_v31 = vpop.f32.mrb[63].mxu1 }
 0x164   : > { %5102 = vmatmul.mubr.msk.bf16.gmra.mrb[120].mxu0 %vm556_vm1, %v5519_v50  ;;  %5162 = vmatmul.mubr.msk.bf16.gmra.mrb[72].mxu1 %vm556_vm1, %v6153_v13 }
 0x165   : > { %5107 = vmatprep.mubr.msk.bf16.mxu0 %vm556_vm1, %v6110_v30  ;;  %5165 = vmatprep.mubr.msk.bf16.mxu1 %vm556_vm1, %v6156_v18 }
 0x167   : > { %v4853_v27 = vpop.f32.mrb[64].mxu1 }
 0x168   : > { %v6399_v29 = vadd.f32 %v4853_v27, %v6128_v37  ;;  %v1233_v59 = vpop.f32.mrb[65].mxu1 }
 0x169   : > { %v4854_v20 = vpop.f32.mrb[66].mxu1 }
 0x16a   : > { %v1235_v32 = vpop.f32.mrb[67].mxu1 }
 0x16b   : > { %v6402_v54 = vadd.f32 %v1235_v32, %v6140_v38 }
 0x16c   : > { %5108 = vmatmul.mubr.msk.bf16.vlgmr.msra.gmra.mrb[28].mxu0 %vm556_vm1, %v6131_v39  ;;  %5166 = vmatmul.mubr.msk.bf16.gmra.mrb[76].mxu1 %vm556_vm1, %v6180_v61 }
 0x16d   : > { %5111 = vmatprep.mubr.msk.bf16.mxu0 %vm556_vm1, %v6138_v0  ;;  %5169 = vmatprep.mubr.msk.bf16.mxu1 %vm556_vm1, %v6188_v43 }
 0x174   : > { %5112 = vmatmul.mubr.msk.bf16.gmra.mrb[32].mxu0 %vm556_vm1, %v6153_v13  ;;  %5170 = vmatmul.mubr.msk.bf16.gmra.mrb[80].mxu1 %vm556_vm1, %v6207_v9 }
 0x175   : > { %5115 = vmatprep.mubr.msk.bf16.mxu0 %vm556_vm1, %v6156_v18  ;;  %5173 = vmatprep.mubr.msk.bf16.mxu1 %vm556_vm1, %v6213_v25 }
 0x17c   : > { %5116 = vmatmul.mubr.msk.bf16.gmra.mrb[36].mxu0 %vm556_vm1, %v6180_v61  ;;  %5174 = vmatmul.mubr.msk.bf16.gmra.mrb[84].mxu1 %vm556_vm1, %v6227_v16 }
 0x17d   : > { %5119 = vmatprep.mubr.msk.bf16.mxu0 %vm556_vm1, %v6188_v43  ;;  %5177 = vmatprep.mubr.msk.bf16.mxu1 %vm556_vm1, %v6230_v21 }
 0x184   : > { %5120 = vmatmul.mubr.msk.bf16.gmra.mrb[40].mxu0 %vm556_vm1, %v6207_v9  ;;  %5178 = vmatmul.mubr.msk.bf16.gmra.mrb[88].mxu1 %vm556_vm1, %v6250_v26 }
 0x185   : > { %5123 = vmatprep.mubr.msk.bf16.mxu0 %vm556_vm1, %v6213_v25  ;;  %5181 = vmatprep.mubr.msk.bf16.mxu1 %vm556_vm1, %v6256_v1 }
 0x18c   : > { %5124 = vmatmul.mubr.msk.bf16.gmra.mrb[44].mxu0 %vm556_vm1, %v6227_v16  ;;  %5182 = vmatmul.mubr.msk.bf16.gmra.mrb[92].mxu1 %vm556_vm1, %v6273_v33 }
 0x18d   : > { %5127 = vmatprep.mubr.msk.bf16.mxu0 %vm556_vm1, %v6230_v21  ;;  %5185 = vmatprep.mubr.msk.bf16.mxu1 %vm556_vm1, %v6279_v17 }
 0x194   : > { %5128 = vmatmul.mubr.msk.bf16.gmra.mrb[48].mxu0 %vm556_vm1, %v6250_v26  ;;  %5186 = vmatmul.mubr.msk.bf16.gmra.mrb[96].mxu1 %vm556_vm1, %v6293_v7 }
 0x195   : > { %5131 = vmatprep.mubr.msk.bf16.mxu0 %vm556_vm1, %v6256_v1  ;;  %5189 = vmatprep.mubr.msk.bf16.mxu1 %vm556_vm1, %v6296_v41 }
 0x19c   : > { %5132 = vmatmul.mubr.msk.bf16.gmra.mrb[52].mxu0 %vm556_vm1, %v6273_v33  ;;  %5190 = vmatmul.mubr.msk.bf16.gmra.mrb[100].mxu1 %vm556_vm1, %v6316_v3 }
 0x19d   : > { %5135 = vmatprep.mubr.msk.bf16.mxu0 %vm556_vm1, %v6279_v17  ;;  %5193 = vmatprep.mubr.msk.bf16.mxu1 %vm556_vm1, %v6322_v8 }
 0x1a4   : > { %5136 = vmatmul.mubr.msk.bf16.gmra.mrb[56].mxu0 %vm556_vm1, %v6293_v7  ;;  %5194 = vmatmul.mubr.msk.bf16.gmra.mrb[104].mxu1 %vm556_vm1, %v6339_v2 }
 0x1a5   : > { %5139 = vmatprep.mubr.msk.bf16.mxu0 %vm556_vm1, %v6296_v41  ;;  %5197 = vmatprep.mubr.msk.bf16.mxu1 %vm556_vm1, %v6345_v36 }
 0x1ac   : > { %5140 = vmatmul.mubr.msk.bf16.gmra.mrb[60].mxu0 %vm556_vm1, %v6316_v3  ;;  %5198 = vmatmul.mubr.msk.bf16.gmra.mrb[108].mxu1 %vm556_vm1, %v6359_v10 }
 0x1ad   : > { %5143 = vmatprep.mubr.msk.bf16.mxu0 %vm556_vm1, %v6322_v8  ;;  %5201 = vmatprep.mubr.msk.bf16.mxu1 %vm556_vm1, %v6362_v55 }
 0x1b4   : > { %5144 = vmatmul.mubr.msk.bf16.gmra.mrb[64].mxu0 %vm556_vm1, %v6339_v2  ;;  %5202 = vmatmul.mubr.msk.bf16.gmra.mrb[112].mxu1 %vm556_vm1, %v5519_v50  ;;  %v5548_v2 = vmov 0.0  }
 0x1b5   : > { %5147 = vmatprep.mubr.msk.bf16.mxu0 %vm556_vm1, %v6345_v36  ;;  %325 = vst.msk [vmem:[#allocation2] sm:$0x1] %vm324_vm2, %v5548_v2  ;;  %5205 = vmatprep.subr.bf16.mxu1 %v5548_v2 }
 0x1b6   : > { %5207 = vmatprep.mubr.msk.bf16.mxu1 %vm5549_vm5, %v5548_v2 }
 0x1bc   : > { %5148 = vmatmul.mubr.msk.bf16.gmra.mrb[68].mxu0 %vm556_vm1, %v6359_v10 }
 0x1bd   : > { %5151 = vmatprep.mubr.msk.bf16.mxu0 %vm556_vm1, %v6362_v55 }
 0x1c4   : > { %5152 = vmatmul.mubr.msk.bf16.gmra.mrb[72].mxu0 %vm556_vm1, %v5519_v50 }
 0x1df   : > { %v5059_v30 = vpop.f32.mrb[76].mxu0 }
 0x1e0   : > { %v2445_v37 = vpop.f32.mrb[77].mxu0 }
 0x1e1   : > { %v6487_v39 = vadd.f32 %v2445_v37, %v6159_v40  ;;  %v5060_v0 = vpop.f32.mrb[78].mxu0 }
 0x1e2   : > { %v6490_v38 = vadd.f32 %v5060_v0, %v6164_v24  ;;  %v2448_v13 = vpop.f32.mrb[79].mxu0 }
 0x1e3   : > { %v6493_v18 = vadd.f32 %v2448_v13, %v6167_v34 }
 0x1e7   : > { %v5063_v61 = vpop.f32.mrb[80].mxu0 }
 0x1e8   : > { %v6496_v43 = vadd.f32 %v5063_v61, %v6183_v5  ;;  %v2460_v9 = vpop.f32.mrb[81].mxu0 }
 0x1e9   : > { %v6499_v25 = vadd.f32 %v2460_v9, %v6191_v63  ;;  %v5064_v16 = vpop.f32.mrb[82].mxu0 }
 0x1ea   : > { %v6502_v40 = vadd.f32 %v5064_v16, %v6196_v14  ;;  %v2463_v21 = vpop.f32.mrb[83].mxu0 }
 0x1ef   : > { %v5067_v26 = vpop.f32.mrb[84].mxu0 }
 0x1f0   : > { %v6505_v24 = vadd.f32 %v5067_v26, %v6210_v11  ;;  %v2475_v1 = vpop.f32.mrb[85].mxu0 }
 0x1f1   : > { %v5068_v34 = vpop.f32.mrb[86].mxu0 }
 0x1f2   : > { %v2477_v33 = vpop.f32.mrb[87].mxu0 }
 0x1f3   : > { %v6508_v17 = vadd.f32 %v2477_v33, %v6216_v45 }
 0x1f7   : > { %v5071_v5 = vpop.f32.mrb[88].mxu0 }
 0x1f8   : > { %v2489_v7 = vpop.f32.mrb[89].mxu0 }
 0x1f9   : > { %v6511_v63 = vadd.f32 %v2489_v7, %v6233_v44  ;;  %v5072_v41 = vpop.f32.mrb[90].mxu0 }
 0x1fa   : > { %v6514_v14 = vadd.f32 %v5072_v41, %v6236_v47  ;;  %v2492_v3 = vpop.f32.mrb[91].mxu0  ;;  %v3824_v47 = vld [vmem:[%s7109_s4] sm:$0x3] }
 0x1fb   : > { %v6517_v8 = vadd.f32 %v2492_v3, %v6239_v19  ;;  %v3837_v10 = vsel %vm3835_vm3, %v3824_v47, 0 }
 0x1fc   : > { %5206 = vmatpush3.bf16.msra.mxu1 %v3837_v10 }
 0x1fd   : > { %5211 = vmatprep.subr.bf16.mxu1 %v5548_v2 }
 0x1ff   : > { %v5075_v11 = vpop.f32.mrb[92].mxu0 }
 0x200   : > { %v6523_v45 = vadd.f32 %v5075_v11, %v6253_v28  ;;  %v2504_v44 = vpop.f32.mrb[93].mxu0 }
 0x201   : > { %v6529_v19 = vadd.f32 %v2504_v44, %v6259_v60  ;;  %v5076_v36 = vpop.f32.mrb[94].mxu0 }
 0x202   : > { %v6533_v55 = vadd.f32 %v5076_v36, %v6262_v46  ;;  %v2507_v50 = vpop.f32.mrb[95].mxu0 }
 0x207   : > { %v5079_v28 = vpop.f32.mrb[96].mxu0 }
 0x208   : > { %v6537_v58 = vadd.f32 %v5079_v28, %v6276_v35  ;;  %v2519_v31 = vpop.f32.mrb[97].mxu0 }
 0x209   : > { %v5080_v27 = vpop.f32.mrb[98].mxu0 }
 0x20a   : > { %v2521_v59 = vpop.f32.mrb[99].mxu0 }
 0x20b   : > { %v6540_v60 = vadd.f32 %v2521_v59, %v6282_v51 }
 0x20f   : > { %v5083_v20 = vpop.f32.mrb[100].mxu0 }
 0x210   : > { %v2533_v32 = vpop.f32.mrb[101].mxu0 }
 0x211   : > { %v6543_v30 = vadd.f32 %v2533_v32, %v6299_v49  ;;  %v5084_v46 = vpop.f32.mrb[102].mxu0 }
 0x212   : > { %v6546_v37 = vadd.f32 %v5084_v46, %v6302_v53  ;;  %v2536_v0 = vpop.f32.mrb[103].mxu0 }
 0x213   : > { %v6549_v13 = vadd.f32 %v2536_v0, %v6305_v42 }
 0x217   : > { %v5087_v35 = vpop.f32.mrb[104].mxu0 }
 0x218   : > { %v6552_v61 = vadd.f32 %v5087_v35, %v6319_v62  ;;  %v2548_v9 = vpop.f32.mrb[105].mxu0 }
 0x219   : > { %v6555_v51 = vadd.f32 %v2548_v9, %v6325_v48  ;;  %v5088_v16 = vpop.f32.mrb[106].mxu0 }
 0x21a   : > { %v6558_v49 = vadd.f32 %v5088_v16, %v6328_v52  ;;  %v2551_v21 = vpop.f32.mrb[107].mxu0 }
 0x21f   : > { %v5091_v26 = vpop.f32.mrb[108].mxu0 }
 0x220   : > { %v6561_v53 = vadd.f32 %v5091_v26, %v6342_v4  ;;  %v2563_v1 = vpop.f32.mrb[109].mxu0 }
 0x221   : > { %v5092_v42 = vpop.f32.mrb[110].mxu0 }
 0x222   : > { %v2565_v34 = vpop.f32.mrb[111].mxu0 }
 0x223   : > { %v6564_v33 = vadd.f32 %v2565_v34, %v6348_v57 }
 0x227   : > { %v5095_v62 = vpop.f32.mrb[112].mxu0 }
 0x228   : > { %v2577_v5 = vpop.f32.mrb[113].mxu0 }
 0x229   : > { %v6567_v48 = vadd.f32 %v2577_v5, %v6365_v15  ;;  %v5096_v7 = vpop.f32.mrb[114].mxu0 }
 0x22a   : > { %v6570_v52 = vadd.f32 %v5096_v7, %v6368_v56  ;;  %v2580_v41 = vpop.f32.mrb[115].mxu0 }
 0x22b   : > { %v6573_v3 = vadd.f32 %v2580_v41, %v6371_v6 }
 0x22f   : > { %v5099_v4 = vpop.f32.mrb[116].mxu0  ;;  %v5159_v44 = vpop.f32.mrb[68].mxu1 }
 0x230   : > { %v6576_v11 = vadd.f32 %v5099_v4, %v6383_v22  ;;  %v2592_v57 = vpop.f32.mrb[117].mxu0  ;;  %v2969_v36 = vpop.f32.mrb[69].mxu1  ;;  %v3453_v6 = vrot.slane %v5159_v44, 2 }
 0x231   : > { %v6579_v47 = vadd.f32 %v2592_v57, %v6386_v23  ;;  %v5100_v15 = vpop.f32.mrb[118].mxu0  ;;  %v5160_v56 = vpop.f32.mrb[70].mxu1  ;;  %v3450_v31 = vrot.slane %v2969_v36, 2 }
 0x232   : > { %v6582_v10 = vadd.f32 %v5100_v15, %v6389_v12  ;;  %v2595_v50 = vpop.f32.mrb[119].mxu0  ;;  %v2972_v28 = vpop.f32.mrb[71].mxu1  ;;  %v3455_v35 = vrot.slane %v5160_v56, 2 }
 0x233   : > { %v3451_v27 = vrot.slane %v2972_v28, 2 }
 0x235   : > { %v3452_v22 = vsel %vm3449_vm4, %v3450_v31, %v3451_v27  ;;  %v3454_v59 = vsel %vm3449_vm4, %v3451_v27, %v3453_v6 }
 0x237   : > { %v5103_v20 = vpop.f32.mrb[120].mxu0  ;;  %v5163_v32 = vpop.f32.mrb[72].mxu1 }
 0x238   : > { %v6587_v23 = vadd.f32 %v5103_v20, %v6399_v29  ;;  %v2607_v46 = vpop.f32.mrb[121].mxu0  ;;  %v2985_v0 = vpop.f32.mrb[73].mxu1  ;;  %v3460_v26 = vrot.slane %v5163_v32, 2 }
 0x239   : > { %v5104_v12 = vpop.f32.mrb[122].mxu0  ;;  %v3456_v9 = vrot.slane %v2985_v0, 2  ;;  %v5164_v16 = vpop.f32.mrb[74].mxu1 }
 0x23a   : > { %v2609_v21 = vpop.f32.mrb[123].mxu0  ;;  %v3461_v1 = vrot.slane %v5164_v16, 2  ;;  %v2988_v34 = vpop.f32.mrb[75].mxu1 }
 0x23b   : > { %v6590_v42 = vadd.f32 %v2609_v21, %v6402_v54  ;;  %v6593_v62 = vsel %vm3449_vm4, %v3455_v35, %v3456_v9  ;;  %v3458_v5 = vrot.slane %v2988_v34, 2 }
 0x23c   : > { %v6596_v29 = vsel %vm3449_vm4, %v3460_v26, %v3461_v1  ;;  %v6619_v26 = vld [vmem:[%s7107_s2] ss:$0 sm:$0xff] }
 0x23d   : > { %v6601_v7 = vsel %vm3449_vm4, %v3456_v9, %v3458_v5 }
 0x23f   : > { %v5109_v41 = vpop.f32.mrb[28].mxu0  ;;  %v5167_v4 = vpop.f32.mrb[76].mxu1 }
 0x240   : > { %v2691_v44 = vpop.f32.mrb[29].mxu0  ;;  %v3001_v54 = vpop.f32.mrb[77].mxu1  ;;  %v3260_v36 = vrot.slane %v5109_v41, 1  ;;  %v3466_v28 = vrot.slane %v5167_v4, 2 }
 0x241   : > { %v5110_v57 = vpop.f32.mrb[30].mxu0  ;;  %v3463_v15 = vrot.slane %v3001_v54, 2  ;;  %v5168_v56 = vpop.f32.mrb[78].mxu1  ;;  %v3257_v6 = vrot.slane %v2691_v44, 1 }
 0x242   : > { %v2694_v50 = vpop.f32.mrb[31].mxu0  ;;  %v3468_v31 = vrot.slane %v5168_v56, 2  ;;  %v3004_v20 = vpop.f32.mrb[79].mxu1  ;;  %v3262_v44 = vrot.slane %v5110_v57, 1 }
 0x243   : > { %v3258_v27 = vrot.slane %v2694_v50, 1  ;;  %v6604_v32 = vsel %vm3449_vm4, %v3461_v1, %v3463_v15  ;;  %v3465_v46 = vrot.slane %v3004_v20, 2 }
 0x244   : > { %v6607_v0 = vsel %vm3449_vm4, %v3466_v28, %v3468_v31 }
 0x245   : > { %v3259_v12 = vsel %vm3256_vm6, %v3257_v6, %v3258_v27  ;;  %v3261_v35 = vsel %vm3256_vm6, %v3258_v27, %v3260_v36  ;;  %v6614_v21 = vsel %vm3449_vm4, %v3465_v46, %v3466_v28 }
 0x246   : > { %v3369_v9 = vadd.f32 %v3259_v12, %v6487_v39  ;;  %v3370_v16 = vadd.f32 %v3261_v35, %v6493_v18  ;;  %v6624_v39 = vld [vmem:[%s7108_s3] ss:$0 sm:$0xff] }
 0x247   : > { %v5113_v1 = vpop.f32.mrb[32].mxu0  ;;  %v5171_v41 = vpop.f32.mrb[80].mxu1 }
 0x248   : > { %v3562_v34 = vadd.f32 %v3452_v22, %v3369_v9  ;;  %v3563_v5 = vadd.f32 %v3454_v59, %v3370_v16  ;;  %v2707_v4 = vpop.f32.mrb[33].mxu0  ;;  %v3017_v54 = vpop.f32.mrb[81].mxu1  ;;  %v3267_v50 = vrot.slane %v5113_v1, 1  ;;  %v3473_v6 = vrot.slane %v5171_v41, 2 }
 0x249   : > { %v3263_v18 = vrot.slane %v2707_v4, 1  ;;  %v5114_v36 = vpop.f32.mrb[34].mxu0  ;;  %v5172_v22 = vpop.f32.mrb[82].mxu1  ;;  %v3470_v9 = vrot.slane %v3017_v54, 2 }
 0x24a   : > { %v3601_v15 = vmul.f32 %v6619_v26, %v3562_v34  ;;  %v3602_v56 = vmul.f32 %v6619_v26, %v3563_v5  ;;  %v3268_v28 = vrot.slane %v5114_v36, 1  ;;  %v2710_v59 = vpop.f32.mrb[35].mxu0  ;;  %v3020_v27 = vpop.f32.mrb[83].mxu1  ;;  %v3475_v36 = vrot.slane %v5172_v22, 2 }
 0x24b   : > { %v3264_v57 = vsel %vm3256_vm6, %v3262_v44, %v3263_v18  ;;  %v3265_v31 = vrot.slane %v2710_v59, 1  ;;  %v3471_v34 = vrot.slane %v3020_v27, 2 }
 0x24c   : > { %v3640_v20 = vadd.f32 %v6624_v39, %v3601_v15  ;;  %v3641_v46 = vadd.f32 %v6624_v39, %v3602_v56  ;;  %v3371_v12 = vadd.f32 %v3264_v57, %v6490_v38  ;;  %v3269_v35 = vsel %vm3256_vm6, %v3267_v50, %v3268_v28 }
 0x24d   : > { %v3373_v16 = vadd.f32 %v3269_v35, %v6496_v43  ;;  %v3266_v1 = vsel %vm3256_vm6, %v3263_v18, %v3265_v31  ;;  %v6645_v15 = vsel %vm3449_vm4, %v3470_v9, %v3471_v34  ;;  %v6648_v56 = vsel %vm3449_vm4, %v3471_v34, %v3473_v6 }
 0x24e   : > { %v3672_v5 = vmax.f32 %v3640_v20, 0.0  ;;  %v3673_v41 = vmax.f32 %v3641_v46, 0.0  ;;  %v3564_v4 = vadd.f32 %v6593_v62, %v3371_v12  ;;  %v3372_v38 = vadd.f32 %v3266_v1, %v6499_v25 }
 0x24f   : > { %v3566_v44 = vadd.f32 %v6596_v29, %v3373_v16  ;;  %v5117_v54 = vpop.f32.mrb[36].mxu0  ;;  %v5175_v18 = vpop.f32.mrb[84].mxu1 }
 0x250   : > { %3707 = vst.msk [vmem:[%s6637_s21] sm:$0xff] %vm3706_vm7, %v3672_v5  ;;  %3708 = vst.msk [vmem:[%s6637_s21 + $0x8] sm:$0xff] %vm3706_vm7, %v3673_v41  ;;  %v3740_v43 = vsel %vm3706_vm7, %v3672_v5, 0.0  ;;  %v3741_v62 = vsel %vm3706_vm7, %v3673_v41, 0.0  ;;  %v3603_v25 = vmul.f32 %v6619_v26, %v3564_v4  ;;  %v3565_v29 = vadd.f32 %v6601_v7, %v3372_v38  ;;  %v2723_v50 = vpop.f32.mrb[37].mxu0  ;;  %v3033_v31 = vpop.f32.mrb[85].mxu1 }
 0x251   : > { %v3742_v22 = vadd.f32 %v3741_v62, %v3740_v43  ;;  %v3605_v59 = vmul.f32 %v6619_v26, %v3566_v44  ;;  %v3273_v6 = vrot.slane %v5117_v54, 1  ;;  %v3480_v57 = vrot.slane %v5175_v18, 2  ;;  %v5118_v27 = vpop.f32.mrb[38].mxu0  ;;  %v5176_v9 = vpop.f32.mrb[86].mxu1 }
 0x252   : > { %v3642_v20 = vadd.f32 %v6624_v39, %v3603_v25  ;;  %v3604_v46 = vmul.f32 %v6619_v26, %v3565_v29  ;;  %v3270_v12 = vrot.slane %v2723_v50, 1  ;;  %v3476_v35 = vrot.slane %v3033_v31, 2  ;;  %v2726_v16 = vpop.f32.mrb[39].mxu0  ;;  %v3036_v41 = vpop.f32.mrb[87].mxu1 }
 0x253   : > { %v3644_v7 = vadd.f32 %v6624_v39, %v3605_v59  ;;  %v3275_v1 = vrot.slane %v5118_v27, 1  ;;  %v3481_v34 = vrot.slane %v5176_v9, 2  ;;  %v3272_v5 = vrot.slane %v2726_v16, 1 }
 0x254   : > { %v3674_v4 = vmax.f32 %v3642_v20, 0.0  ;;  %v3643_v38 = vadd.f32 %v6624_v39, %v3604_v46  ;;  %v3271_v44 = vsel %vm3256_vm6, %v3268_v28, %v3270_v12  ;;  %v6665_v54 = vsel %vm3449_vm4, %v3475_v36, %v3476_v35 }
 0x255   : > { %v3676_v43 = vmax.f32 %v3644_v7, 0.0  ;;  %v3374_v62 = vadd.f32 %v3271_v44, %v6502_v40  ;;  %v3276_v25 = vsel %vm3256_vm6, %v3273_v6, %v3275_v1  ;;  %v6670_v29 = vsel %vm3449_vm4, %v3480_v57, %v3481_v34 }
 0x256   : > { %3709 = vst.msk [vmem:[%s6637_s21 + $0x10] sm:$0xff] %vm3706_vm7, %v3674_v4  ;;  %v3743_v18 = vsel %vm3706_vm7, %v3674_v4, 0.0  ;;  %v3675_v50 = vmax.f32 %v3643_v38, 0.0  ;;  %v3376_v59 = vadd.f32 %v3276_v25, %v6505_v24  ;;  %v3274_v28 = vsel %vm3256_vm6, %v3272_v5, %v3273_v6 }
 0x257   : > { %v3744_v36 = vadd.f32 %v3743_v18, %v3742_v22  ;;  %3711 = vst.msk [vmem:[%s6637_s21 + $0x20] sm:$0xff] %vm3706_vm7, %v3676_v43  ;;  %v3567_v31 = vadd.f32 %v6604_v32, %v3374_v62  ;;  %v3375_v40 = vadd.f32 %v3274_v28, %v6508_v17  ;;  %v5121_v27 = vpop.f32.mrb[40].mxu0  ;;  %v3747_v57 = vsel %vm3706_vm7, %v3676_v43, 0.0  ;;  %v5179_v24 = vpop.f32.mrb[88].mxu1 }
 0x258   : > { %3710 = vst.msk [vmem:[%s6637_s21 + $0x18] sm:$0xff] %vm3706_vm7, %v3675_v50  ;;  %v3745_v20 = vsel %vm3706_vm7, %v3675_v50, 0.0  ;;  %v3569_v46 = vadd.f32 %v6607_v0, %v3376_v59  ;;  %v3478_v12 = vrot.slane %v3036_v41, 2  ;;  %v2739_v9 = vpop.f32.mrb[41].mxu0  ;;  %v3280_v32 = vrot.slane %v5121_v27, 1  ;;  %v3049_v7 = vpop.f32.mrb[89].mxu1 }
 0x259   : > { %v3746_v6 = vadd.f32 %v3745_v20, %v3744_v36  ;;  %v3606_v22 = vmul.f32 %v6619_v26, %v3567_v31  ;;  %v3568_v16 = vadd.f32 %v6614_v21, %v3375_v40  ;;  %v5122_v17 = vpop.f32.mrb[42].mxu0  ;;  %v3486_v4 = vrot.slane %v5179_v24, 2  ;;  %v5180_v44 = vpop.f32.mrb[90].mxu1 }
 0x25a   : > { %v3608_v1 = vmul.f32 %v6619_v26, %v3569_v46  ;;  %v6690_v5 = vsel %vm3449_vm4, %v3476_v35, %v3478_v12  ;;  %v3483_v38 = vrot.slane %v3049_v7, 2  ;;  %v2742_v0 = vpop.f32.mrb[43].mxu0  ;;  %v3277_v25 = vrot.slane %v2739_v9, 1  ;;  %v3052_v21 = vpop.f32.mrb[91].mxu1 }
 0x25b   : > { %v3645_v41 = vadd.f32 %v6624_v39, %v3606_v22  ;;  %v3748_v43 = vadd.f32 %v3747_v57, %v3746_v6  ;;  %v3607_v62 = vmul.f32 %v6619_v26, %v3568_v16  ;;  %v3488_v59 = vrot.slane %v5180_v44, 2 }
 0x25c   : > { %v3647_v18 = vadd.f32 %v6624_v39, %v3608_v1  ;;  %v6696_v50 = vsel %vm3449_vm4, %v3481_v34, %v3483_v38  ;;  %v3278_v35 = vrot.slane %v2742_v0, 1  ;;  %v3485_v31 = vrot.slane %v3052_v21, 2 }
 0x25d   : > { %v3677_v28 = vmax.f32 %v3645_v41, 0.0  ;;  %v3646_v36 = vadd.f32 %v6624_v39, %v3607_v62  ;;  %v6700_v27 = vsel %vm3449_vm4, %v3486_v4, %v3488_v59  ;;  %v3282_v16 = vrot.slane %v5122_v17, 1 }
 0x25e   : > { %v3679_v40 = vmax.f32 %v3647_v18, 0.0  ;;  %v3279_v57 = vsel %vm3256_vm6, %v3277_v25, %v3278_v35  ;;  %v3281_v20 = vsel %vm3256_vm6, %v3278_v35, %v3280_v32  ;;  %v6713_v7 = vsel %vm3449_vm4, %v3485_v31, %v3486_v4 }
 0x25f   : > { %3712 = vst.msk [vmem:[%s6637_s21 + $0x28] sm:$0xff] %vm3706_vm7, %v3677_v28  ;;  %v3749_v34 = vsel %vm3706_vm7, %v3677_v28, 0.0  ;;  %v3678_v46 = vmax.f32 %v3646_v36, 0.0  ;;  %v3377_v12 = vadd.f32 %v3279_v57, %v6511_v63  ;;  %v3378_v24 = vadd.f32 %v3281_v20, %v6517_v8  ;;  %v5125_v9 = vpop.f32.mrb[44].mxu0  ;;  %v5183_v32 = vpop.f32.mrb[92].mxu1 }
 0x260   : > { %v3750_v6 = vadd.f32 %v3749_v34, %v3748_v43  ;;  %3714 = vst.msk [vmem:[%s6637_s21 + $0x38] sm:$0xff] %vm3706_vm7, %v3679_v40  ;;  %v3753_v22 = vsel %vm3706_vm7, %v3679_v40, 0.0  ;;  %v2755_v1 = vpop.f32.mrb[45].mxu0  ;;  %v3287_v44 = vrot.slane %v5125_v9, 1  ;;  %v3065_v0 = vpop.f32.mrb[93].mxu1  ;;  %v3493_v62 = vrot.slane %v5183_v32, 2 }
 0x261   : > { %3713 = vst.msk [vmem:[%s6637_s21 + $0x30] sm:$0xff] %vm3706_vm7, %v3678_v46  ;;  %v3751_v38 = vsel %vm3706_vm7, %v3678_v46, 0.0  ;;  %v3570_v63 = vadd.f32 %v6645_v15, %v3377_v12  ;;  %v3571_v8 = vadd.f32 %v6648_v56, %v3378_v24  ;;  %v5126_v41 = vpop.f32.mrb[46].mxu0  ;;  %v3283_v25 = vrot.slane %v2755_v1, 1  ;;  %v5184_v21 = vpop.f32.mrb[94].mxu1 }
 0x262   : > { %v3752_v43 = vadd.f32 %v3751_v38, %v3750_v6  ;;  %v3288_v17 = vrot.slane %v5126_v41, 1  ;;  %v2758_v4 = vpop.f32.mrb[47].mxu0  ;;  %v3490_v35 = vrot.slane %v3065_v0, 2  ;;  %v3068_v36 = vpop.f32.mrb[95].mxu1  ;;  %v3495_v38 = vrot.slane %v5184_v21, 2 }
 0x263   : > { %v3609_v18 = vmul.f32 %v6619_v26, %v3570_v63  ;;  %v3610_v59 = vmul.f32 %v6619_v26, %v3571_v8  ;;  %v3285_v28 = vrot.slane %v2758_v4, 1  ;;  %v3284_v15 = vsel %vm3256_vm6, %v3282_v16, %v3283_v25 }
 0x264   : > { %v3754_v31 = vadd.f32 %v3753_v22, %v3752_v43  ;;  %v3289_v56 = vsel %vm3256_vm6, %v3287_v44, %v3288_v17  ;;  %v3491_v40 = vrot.slane %v3068_v36, 2  ;;  %v3379_v34 = vadd.f32 %v3284_v15, %v6514_v14 }
 0x265   : > { %v3648_v57 = vadd.f32 %v6624_v39, %v3609_v18  ;;  %v3649_v20 = vadd.f32 %v6624_v39, %v3610_v59  ;;  %v3381_v46 = vadd.f32 %v3289_v56, %v6523_v45  ;;  %v3286_v12 = vsel %vm3256_vm6, %v3283_v25, %v3285_v28 }
 0x266   : > { %v6730_v24 = vsel %vm3449_vm4, %v3490_v35, %v3491_v40  ;;  %v6733_v9 = vsel %vm3449_vm4, %v3491_v40, %v3493_v62  ;;  %v3572_v16 = vadd.f32 %v6665_v54, %v3379_v34  ;;  %v3380_v14 = vadd.f32 %v3286_v12, %v6529_v19 }
 0x267   : > { %v3680_v6 = vmax.f32 %v3648_v57, 0.0  ;;  %v3681_v22 = vmax.f32 %v3649_v20, 0.0  ;;  %v3574_v32 = vadd.f32 %v6670_v29, %v3381_v46  ;;  %v5129_v1 = vpop.f32.mrb[48].mxu0  ;;  %v5187_v45 = vpop.f32.mrb[96].mxu1 }
 0x268   : > { %v3293_v63 = vrot.slane %v5129_v1, 1  ;;  %v2771_v8 = vpop.f32.mrb[49].mxu0  ;;  %v3611_v41 = vmul.f32 %v6619_v26, %v3572_v16  ;;  %v3081_v29 = vpop.f32.mrb[97].mxu1  ;;  %v3573_v19 = vadd.f32 %v6690_v5, %v3380_v14  ;;  %v3500_v25 = vrot.slane %v5187_v45, 2 }
 0x269   : > { %3715 = vst.msk [vmem:[%s6637_s21 + $0x40] sm:$0xff] %vm3706_vm7, %v3680_v6  ;;  %3716 = vst.msk [vmem:[%s6637_s21 + $0x48] sm:$0xff] %vm3706_vm7, %v3681_v22  ;;  %v3755_v44 = vsel %vm3706_vm7, %v3680_v6, 0.0  ;;  %v3757_v0 = vsel %vm3706_vm7, %v3681_v22, 0.0  ;;  %v3613_v54 = vmul.f32 %v6619_v26, %v3574_v32  ;;  %v5130_v43 = vpop.f32.mrb[50].mxu0  ;;  %v3290_v21 = vrot.slane %v2771_v8, 1 }
 0x26a   : > { %v3756_v62 = vadd.f32 %v3755_v44, %v3754_v31  ;;  %v5188_v4 = vpop.f32.mrb[98].mxu1  ;;  %v2774_v18 = vpop.f32.mrb[51].mxu0  ;;  %v3650_v59 = vadd.f32 %v6624_v39, %v3611_v41  ;;  %v3496_v28 = vrot.slane %v3081_v29, 2  ;;  %v3295_v36 = vrot.slane %v5130_v43, 1 }
 0x26b   : > { %v3652_v35 = vadd.f32 %v6624_v39, %v3613_v54  ;;  %v3084_v15 = vpop.f32.mrb[99].mxu1  ;;  %v3612_v40 = vmul.f32 %v6619_v26, %v3573_v19  ;;  %v3291_v31 = vsel %vm3256_vm6, %v3288_v17, %v3290_v21  ;;  %v3501_v57 = vrot.slane %v5188_v4, 2 }
 0x26c   : > { %v3758_v56 = vadd.f32 %v3757_v0, %v3756_v62  ;;  %v3682_v5 = vmax.f32 %v3650_v59, 0.0  ;;  %v3382_v34 = vadd.f32 %v3291_v31, %v6533_v55  ;;  %v6753_v46 = vsel %vm3449_vm4, %v3495_v38, %v3496_v28 }
 0x26d   : > { %v3684_v20 = vmax.f32 %v3652_v35, 0.0  ;;  %v3651_v12 = vadd.f32 %v6624_v39, %v3612_v40  ;;  %v3296_v6 = vsel %vm3256_vm6, %v3293_v63, %v3295_v36  ;;  %v6758_v22 = vsel %vm3449_vm4, %v3500_v25, %v3501_v57 }
 0x26e   : > { %v3292_v16 = vrot.slane %v2774_v18, 1  ;;  %3717 = vst.msk [vmem:[%s6637_s21 + $0x50] sm:$0xff] %vm3706_vm7, %v3682_v5  ;;  %v3759_v17 = vsel %vm3706_vm7, %v3682_v5, 0.0  ;;  %v3575_v55 = vadd.f32 %v6696_v50, %v3382_v34  ;;  %v3384_v1 = vadd.f32 %v3296_v6, %v6537_v58 }
 0x26f   : > { %3719 = vst.msk [vmem:[%s6637_s21 + $0x60] sm:$0xff] %vm3706_vm7, %v3684_v20  ;;  %v3763_v32 = vsel %vm3706_vm7, %v3684_v20, 0.0  ;;  %v5133_v38 = vpop.f32.mrb[52].mxu0  ;;  %v3760_v14 = vadd.f32 %v3759_v17, %v3758_v56  ;;  %v3683_v45 = vmax.f32 %v3651_v12, 0.0  ;;  %v3498_v44 = vrot.slane %v3084_v15, 2  ;;  %v5191_v0 = vpop.f32.mrb[100].mxu1 }
 0x270   : > { %v3294_v8 = vsel %vm3256_vm6, %v3292_v16, %v3293_v63  ;;  %v2787_v41 = vpop.f32.mrb[53].mxu0  ;;  %v3614_v54 = vmul.f32 %v6619_v26, %v3575_v55  ;;  %v3577_v29 = vadd.f32 %v6700_v27, %v3384_v1  ;;  %v3300_v62 = vrot.slane %v5133_v38, 1  ;;  %v3097_v19 = vpop.f32.mrb[101].mxu1 }
 0x271   : > { %v3383_v43 = vadd.f32 %v3294_v8, %v6540_v60  ;;  %v5134_v25 = vpop.f32.mrb[54].mxu0  ;;  %3718 = vst.msk [vmem:[%s6637_s21 + $0x58] sm:$0xff] %vm3706_vm7, %v3683_v45  ;;  %v3761_v58 = vsel %vm3706_vm7, %v3683_v45, 0.0  ;;  %v6776_v50 = vsel %vm3449_vm4, %v3496_v28, %v3498_v44  ;;  %v3506_v63 = vrot.slane %v5191_v0, 2  ;;  %v5192_v4 = vpop.f32.mrb[102].mxu1 }
 0x272   : > { %v3297_v21 = vrot.slane %v2787_v41, 1  ;;  %v2790_v18 = vpop.f32.mrb[55].mxu0  ;;  %v3762_v59 = vadd.f32 %v3761_v58, %v3760_v14  ;;  %v3653_v35 = vadd.f32 %v6624_v39, %v3614_v54  ;;  %v3616_v60 = vmul.f32 %v6619_v26, %v3577_v29  ;;  %v3100_v36 = vpop.f32.mrb[103].mxu1 }
 0x273   : > { %v3576_v27 = vadd.f32 %v6713_v7, %v3383_v43  ;;  %v3503_v15 = vrot.slane %v3097_v19, 2  ;;  %v3302_v56 = vrot.slane %v5134_v25, 1  ;;  %v3508_v40 = vrot.slane %v5192_v4, 2 }
 0x274   : > { %v3298_v31 = vrot.slane %v2790_v18, 1  ;;  %v3685_v5 = vmax.f32 %v3653_v35, 0.0  ;;  %v3764_v28 = vadd.f32 %v3763_v32, %v3762_v59  ;;  %v3655_v20 = vadd.f32 %v6624_v39, %v3616_v60 }
 0x275   : > { %v3615_v34 = vmul.f32 %v6619_v26, %v3576_v27  ;;  %v6784_v12 = vsel %vm3449_vm4, %v3501_v57, %v3503_v15  ;;  %v6787_v6 = vsel %vm3449_vm4, %v3506_v63, %v3508_v40  ;;  %v3505_v45 = vrot.slane %v3100_v36, 2 }
 0x276   : > { %v3299_v7 = vsel %vm3256_vm6, %v3297_v21, %v3298_v31  ;;  %v3301_v16 = vsel %vm3256_vm6, %v3298_v31, %v3300_v62  ;;  %3720 = vst.msk [vmem:[%s6637_s21 + $0x68] sm:$0xff] %vm3706_vm7, %v3685_v5  ;;  %v3765_v17 = vsel %vm3706_vm7, %v3685_v5, 0.0  ;;  %v3687_v32 = vmax.f32 %v3655_v20, 0.0 }
 0x277   : > { %v3654_v55 = vadd.f32 %v6624_v39, %v3615_v34  ;;  %v3385_v1 = vadd.f32 %v3299_v7, %v6543_v30  ;;  %v5137_v38 = vpop.f32.mrb[56].mxu0  ;;  %v3766_v57 = vadd.f32 %v3765_v17, %v3764_v28  ;;  %v3386_v14 = vadd.f32 %v3301_v16, %v6549_v13  ;;  %v5195_v44 = vpop.f32.mrb[104].mxu1 }
 0x278   : > { %v3307_v8 = vrot.slane %v5137_v38, 1  ;;  %v2803_v0 = vpop.f32.mrb[57].mxu0  ;;  %3722 = vst.msk [vmem:[%s6637_s21 + $0x78] sm:$0xff] %vm3706_vm7, %v3687_v32  ;;  %v3769_v41 = vsel %vm3706_vm7, %v3687_v32, 0.0  ;;  %v3513_v43 = vrot.slane %v5195_v44, 2  ;;  %v3113_v62 = vpop.f32.mrb[105].mxu1  ;;  %v6803_v25 = vsel %vm3449_vm4, %v3505_v45, %v3506_v63 }
 0x279   : > { %v3686_v54 = vmax.f32 %v3654_v55, 0.0  ;;  %v3578_v29 = vadd.f32 %v6730_v24, %v3385_v1  ;;  %v5138_v19 = vpop.f32.mrb[58].mxu0  ;;  %v3579_v30 = vadd.f32 %v6733_v9, %v3386_v14  ;;  %v3303_v13 = vrot.slane %v2803_v0, 1  ;;  %v5196_v21 = vpop.f32.mrb[106].mxu1 }
 0x27a   : > { %v3510_v58 = vrot.slane %v3113_v62, 2  ;;  %v2806_v4 = vpop.f32.mrb[59].mxu0  ;;  %v3308_v35 = vrot.slane %v5138_v19, 1  ;;  %v3515_v24 = vrot.slane %v5196_v21, 2  ;;  %v3116_v60 = vpop.f32.mrb[107].mxu1 }
 0x27b   : > { %3721 = vst.msk [vmem:[%s6637_s21 + $0x70] sm:$0xff] %vm3706_vm7, %v3686_v54  ;;  %v3767_v18 = vsel %vm3706_vm7, %v3686_v54, 0.0  ;;  %v3617_v59 = vmul.f32 %v6619_v26, %v3578_v29  ;;  %v3618_v36 = vmul.f32 %v6619_v26, %v3579_v30  ;;  %v3304_v9 = vsel %vm3256_vm6, %v3302_v56, %v3303_v13 }
 0x27c   : > { %v3768_v27 = vadd.f32 %v3767_v18, %v3766_v57  ;;  %v3305_v63 = vrot.slane %v2806_v4, 1  ;;  %v3387_v40 = vadd.f32 %v3304_v9, %v6546_v37  ;;  %v3309_v31 = vsel %vm3256_vm6, %v3307_v8, %v3308_v35 }
 0x27d   : > { %v3656_v15 = vadd.f32 %v6624_v39, %v3617_v59  ;;  %v3511_v5 = vrot.slane %v3116_v60, 2  ;;  %v3657_v28 = vadd.f32 %v6624_v39, %v3618_v36  ;;  %v3389_v34 = vadd.f32 %v3309_v31, %v6552_v61 }
 0x27e   : > { %v3770_v20 = vadd.f32 %v3769_v41, %v3768_v27  ;;  %v3306_v7 = vsel %vm3256_vm6, %v3303_v13, %v3305_v63  ;;  %v3580_v17 = vadd.f32 %v6753_v46, %v3387_v40 }
 0x27f   : > { %v3688_v16 = vmax.f32 %v3656_v15, 0.0  ;;  %v3388_v56 = vadd.f32 %v3306_v7, %v6555_v51  ;;  %v6820_v32 = vsel %vm3449_vm4, %v3510_v58, %v3511_v5  ;;  %v5141_v37 = vpop.f32.mrb[60].mxu0  ;;  %v3689_v55 = vmax.f32 %v3657_v28, 0.0  ;;  %v5199_v61 = vpop.f32.mrb[108].mxu1 }
 0x280   : > { %v3582_v1 = vadd.f32 %v6758_v22, %v3389_v34  ;;  %v6824_v38 = vsel %vm3449_vm4, %v3511_v5, %v3513_v43  ;;  %v3313_v57 = vrot.slane %v5141_v37, 1  ;;  %v2819_v14 = vpop.f32.mrb[61].mxu0  ;;  %v3619_v51 = vmul.f32 %v6619_v26, %v3580_v17  ;;  %v3129_v44 = vpop.f32.mrb[109].mxu1 }
 0x281   : > { %3723 = vst.msk [vmem:[%s6637_s21 + $0x80] sm:$0xff] %vm3706_vm7, %v3688_v16  ;;  %v3771_v46 = vsel %vm3706_vm7, %v3688_v16, 0.0  ;;  %v3581_v45 = vadd.f32 %v6776_v50, %v3388_v56  ;;  %v3520_v8 = vrot.slane %v5199_v61, 2  ;;  %v5142_v0 = vpop.f32.mrb[62].mxu0  ;;  %3724 = vst.msk [vmem:[%s6637_s21 + $0x88] sm:$0xff] %vm3706_vm7, %v3689_v55  ;;  %v3773_v41 = vsel %vm3706_vm7, %v3689_v55, 0.0 }
 0x282   : > { %v3772_v22 = vadd.f32 %v3771_v46, %v3770_v20  ;;  %v3621_v54 = vmul.f32 %v6619_v26, %v3582_v1  ;;  %v3310_v29 = vrot.slane %v2819_v14, 1  ;;  %v5200_v43 = vpop.f32.mrb[110].mxu1  ;;  %v2822_v62 = vpop.f32.mrb[63].mxu0  ;;  %v3658_v19 = vadd.f32 %v6624_v39, %v3619_v51 }
 0x283   : > { %v3620_v30 = vmul.f32 %v6619_v26, %v3581_v45  ;;  %v3516_v13 = vrot.slane %v3129_v44, 2  ;;  %v3315_v50 = vrot.slane %v5142_v0, 1  ;;  %v3132_v58 = vpop.f32.mrb[111].mxu1  ;;  %v3521_v59 = vrot.slane %v5200_v43, 2 }
 0x284   : > { %v3774_v21 = vadd.f32 %v3773_v41, %v3772_v22  ;;  %v3660_v4 = vadd.f32 %v6624_v39, %v3621_v54  ;;  %v3311_v18 = vsel %vm3256_vm6, %v3308_v35, %v3310_v29  ;;  %v3690_v60 = vmax.f32 %v3658_v19, 0.0 }
 0x285   : > { %v3659_v27 = vadd.f32 %v6624_v39, %v3620_v30  ;;  %v3390_v36 = vadd.f32 %v3311_v18, %v6558_v49  ;;  %v6842_v9 = vsel %vm3449_vm4, %v3515_v24, %v3516_v13  ;;  %v3316_v15 = vsel %vm3256_vm6, %v3313_v57, %v3315_v50 }
 0x286   : > { %v3692_v63 = vmax.f32 %v3660_v4, 0.0  ;;  %v6846_v40 = vsel %vm3449_vm4, %v3520_v8, %v3521_v59  ;;  %v3312_v31 = vrot.slane %v2822_v62, 1  ;;  %3725 = vst.msk [vmem:[%s6637_s21 + $0x90] sm:$0xff] %vm3706_vm7, %v3690_v60  ;;  %v3775_v35 = vsel %vm3706_vm7, %v3690_v60, 0.0 }
 0x287   : > { %v3691_v5 = vmax.f32 %v3659_v27, 0.0  ;;  %v3583_v28 = vadd.f32 %v6784_v12, %v3390_v36  ;;  %v3392_v49 = vadd.f32 %v3316_v15, %v6561_v53  ;;  %v5145_v20 = vpop.f32.mrb[64].mxu0  ;;  %v3776_v24 = vadd.f32 %v3775_v35, %v3774_v21  ;;  %v5203_v16 = vpop.f32.mrb[112].mxu1 }
 0x288   : > { %3727 = vst.msk [vmem:[%s6637_s21 + $0xa0] sm:$0xff] %vm3706_vm7, %v3692_v63  ;;  %v3314_v34 = vsel %vm3256_vm6, %v3312_v31, %v3313_v57  ;;  %v3518_v7 = vrot.slane %v3132_v58, 2  ;;  %v2835_v17 = vpop.f32.mrb[65].mxu0  ;;  %v3145_v53 = vpop.f32.mrb[113].mxu1  ;;  %v3779_v61 = vsel %vm3706_vm7, %v3692_v63, 0.0  ;;  %v3526_v0 = vrot.slane %v5203_v16, 2 }
 0x289   : > { %3726 = vst.msk [vmem:[%s6637_s21 + $0x98] sm:$0xff] %vm3706_vm7, %v3691_v5  ;;  %v3777_v56 = vsel %vm3706_vm7, %v3691_v5, 0.0  ;;  %v3622_v37 = vmul.f32 %v6619_v26, %v3583_v28  ;;  %v3585_v55 = vadd.f32 %v6787_v6, %v3392_v49  ;;  %v3391_v12 = vadd.f32 %v3314_v34, %v6564_v33  ;;  %v5146_v1 = vpop.f32.mrb[66].mxu0  ;;  %v5204_v46 = vpop.f32.mrb[114].mxu1 }
 0x28a   : > { %v3778_v14 = vadd.f32 %v3777_v56, %v3776_v24  ;;  %v3519_v57 = vsel %vm3449_vm4, %v3516_v13, %v3518_v7  ;;  %v2838_v51 = vpop.f32.mrb[67].mxu0  ;;  %v3148_v6 = vpop.f32.mrb[115].mxu1  ;;  %v3317_v33 = vrot.slane %v2835_v17, 1  ;;  %v3523_v41 = vrot.slane %v3145_v53, 2 }
 0x28b   : > { %v3661_v45 = vadd.f32 %v6624_v39, %v3622_v37  ;;  %v3624_v8 = vmul.f32 %v6619_v26, %v3585_v55  ;;  %v3584_v44 = vadd.f32 %v6803_v25, %v3391_v12  ;;  %v3528_v54 = vrot.slane %v5204_v46, 2 }
 0x28c   : > { %v3780_v22 = vadd.f32 %v3779_v61, %v3778_v14  ;;  %v3318_v19 = vrot.slane %v2838_v51, 1  ;;  %v3320_v30 = vrot.slane %v5145_v20, 1  ;;  %v6870_v13 = vsel %vm3449_vm4, %v3521_v59, %v3523_v41 }
 0x28d   : > { %v3693_v29 = vmax.f32 %v3661_v45, 0.0  ;;  %v3663_v43 = vadd.f32 %v6624_v39, %v3624_v8  ;;  %v3623_v62 = vmul.f32 %v6619_v26, %v3584_v44  ;;  %v6873_v50 = vsel %vm3449_vm4, %v3526_v0, %v3528_v54 }
 0x28e   : > { %v3525_v25 = vrot.slane %v3148_v6, 2  ;;  %v3319_v18 = vsel %vm3256_vm6, %v3317_v33, %v3318_v19  ;;  %v3321_v36 = vsel %vm3256_vm6, %v3318_v19, %v3320_v30  ;;  %v3322_v35 = vrot.slane %v5146_v1, 1 }
 0x28f   : > { %3728 = vst.msk [vmem:[%s6637_s21 + $0xa8] sm:$0xff] %vm3706_vm7, %v3693_v29  ;;  %v3781_v58 = vsel %vm3706_vm7, %v3693_v29, 0.0  ;;  %v3695_v21 = vmax.f32 %v3663_v43, 0.0  ;;  %v3662_v4 = vadd.f32 %v6624_v39, %v3623_v62  ;;  %v5149_v60 = vpop.f32.mrb[68].mxu0  ;;  %v3393_v59 = vadd.f32 %v3319_v18, %v6567_v48 }
 0x290   : > { %v3782_v27 = vadd.f32 %v3781_v58, %v3780_v22  ;;  %v6883_v63 = vsel %vm3449_vm4, %v3525_v25, %v3526_v0  ;;  %v2851_v15 = vpop.f32.mrb[69].mxu0  ;;  %v3394_v5 = vadd.f32 %v3321_v36, %v6573_v3  ;;  %v3327_v20 = vrot.slane %v5149_v60, 1 }
 0x291   : > { %3730 = vst.msk [vmem:[%s6637_s21 + $0xb8] sm:$0xff] %vm3706_vm7, %v3695_v21  ;;  %v3694_v31 = vmax.f32 %v3662_v4, 0.0  ;;  %v5150_v28 = vpop.f32.mrb[70].mxu0  ;;  %v3586_v49 = vadd.f32 %v6820_v32, %v3393_v59  ;;  %v3323_v24 = vrot.slane %v2851_v15, 1  ;;  %v3785_v16 = vsel %vm3706_vm7, %v3695_v21, 0.0 }
 0x292   : > { %v3328_v34 = vrot.slane %v5150_v28, 1  ;;  %v2854_v7 = vpop.f32.mrb[71].mxu0  ;;  %v3587_v17 = vadd.f32 %v6824_v38, %v3394_v5 }
 0x293   : > { %3729 = vst.msk [vmem:[%s6637_s21 + $0xb0] sm:$0xff] %vm3706_vm7, %v3694_v31  ;;  %v3783_v48 = vsel %vm3706_vm7, %v3694_v31, 0.0  ;;  %v3325_v56 = vrot.slane %v2854_v7, 1  ;;  %v3625_v55 = vmul.f32 %v6619_v26, %v3586_v49  ;;  %v3324_v3 = vsel %vm3256_vm6, %v3322_v35, %v3323_v24 }
 0x294   : > { %v3784_v37 = vadd.f32 %v3783_v48, %v3782_v27  ;;  %v3329_v32 = vsel %vm3256_vm6, %v3327_v20, %v3328_v34  ;;  %v3626_v12 = vmul.f32 %v6619_v26, %v3587_v17  ;;  %v3395_v53 = vadd.f32 %v3324_v3, %v6570_v52 }
 0x295   : > { %v3397_v1 = vadd.f32 %v3329_v32, %v6576_v11  ;;  %v3326_v61 = vsel %vm3256_vm6, %v3323_v24, %v3325_v56  ;;  %v3664_v14 = vadd.f32 %v6624_v39, %v3625_v55 }
 0x296   : > { %v3786_v38 = vadd.f32 %v3785_v16, %v3784_v37  ;;  %v3396_v46 = vadd.f32 %v3326_v61, %v6579_v47  ;;  %v3665_v51 = vadd.f32 %v6624_v39, %v3626_v12  ;;  %v3588_v45 = vadd.f32 %v6842_v9, %v3395_v53 }
 0x297   : > { %v3590_v8 = vadd.f32 %v6846_v40, %v3397_v1  ;;  %v5153_v44 = vpop.f32.mrb[72].mxu0  ;;  %v3696_v0 = vmax.f32 %v3664_v14, 0.0 }
 0x298   : > { %v3589_v52 = vadd.f32 %v3519_v57, %v3396_v46  ;;  %v2867_v6 = vpop.f32.mrb[73].mxu0  ;;  %v3697_v11 = vmax.f32 %v3665_v51, 0.0  ;;  %v3627_v22 = vmul.f32 %v6619_v26, %v3588_v45  ;;  %v3333_v29 = vrot.slane %v5153_v44, 1  ;;  %v3739_v46 = vld [vmem:[#allocation2] sm:$0x1] }
 0x299   : > { %v3629_v33 = vmul.f32 %v6619_v26, %v3590_v8  ;;  %v3330_v41 = vrot.slane %v2867_v6, 1  ;;  %v5154_v54 = vpop.f32.mrb[74].mxu0  ;;  %3731 = vst.msk [vmem:[%s6637_s21 + $0xc0] sm:$0xff] %vm3706_vm7, %v3696_v0  ;;  %v3787_v47 = vsel %vm3706_vm7, %v3696_v0, 0.0  ;;  %v3818_v8 = vlaneseq }
 0x29a   : > { %v3628_v9 = vmul.f32 %v6619_v26, %v3589_v52  ;;  %v3335_v40 = vrot.slane %v5154_v54, 1  ;;  %v2870_v43 = vpop.f32.mrb[75].mxu0  ;;  %3732 = vst.msk [vmem:[%s6637_s21 + $0xc8] sm:$0xff] %vm3706_vm7, %v3697_v11  ;;  %v3788_v57 = vadd.f32 %v3787_v47, %v3786_v38  ;;  %v3789_v62 = vsel %vm3706_vm7, %v3697_v11, 0.0  ;;  %v3881_v11 = vld [vmem:[%s7111_s6] sm:$0x3] }
 0x29b   : > { %v3666_v19 = vadd.f32 %v6624_v39, %v3627_v22  ;;  %v3668_v30 = vadd.f32 %v6624_v39, %v3629_v33  ;;  %v3331_v58 = vsel %vm3256_vm6, %v3328_v34, %v3330_v41  ;;  %v3332_v4 = vrot.slane %v2870_v43, 1  ;;  %v4519_v54 = vld [vmem:[%s7110_s5] ss:$0 sm:$0xff] }
 0x29c   : > { %v3667_v25 = vadd.f32 %v6624_v39, %v3628_v9  ;;  %v3336_v21 = vsel %vm3256_vm6, %v3333_v29, %v3335_v40  ;;  %v3790_v18 = vadd.f32 %v3789_v62, %v3788_v57  ;;  %v3398_v36 = vadd.f32 %v3331_v58, %v6582_v10 }
 0x29d   : > { %v3698_v60 = vmax.f32 %v3666_v19, 0.0  ;;  %v3700_v27 = vmax.f32 %v3668_v30, 0.0  ;;  %v3400_v15 = vadd.f32 %v3336_v21, %v6587_v23  ;;  %v3334_v31 = vsel %vm3256_vm6, %v3332_v4, %v3333_v29  ;;  %v4521_v19 = vld [vmem:[%s7112_s7] ss:$0 sm:$0xff] }
 0x29e   : > { %v3699_v59 = vmax.f32 %v3667_v25, 0.0  ;;  %v3591_v5 = vadd.f32 %v6870_v13, %v3398_v36  ;;  %v3399_v28 = vadd.f32 %v3334_v31, %v6590_v42  ;;  %v3819_v44 = vshrl.u32 %v3818_v8, 7  ;;  %v3942_v31 = vld [vmem:[%s6637_s21 + $0x8] sm:$0xff]  ;;  %v3964_v8 = vld [vmem:[%s6637_s21 + $0xb8] sm:$0xff] }
 0x29f   : > { %3733 = vst.msk [vmem:[%s6637_s21 + $0xd0] sm:$0xff] %vm3706_vm7, %v3698_v60  ;;  %v3791_v35 = vsel %vm3706_vm7, %v3698_v60, 0.0  ;;  %3735 = vst.msk [vmem:[%s6637_s21 + $0xe0] sm:$0xff] %vm3706_vm7, %v3700_v27  ;;  %v3593_v23 = vadd.f32 %v6873_v50, %v3400_v15  ;;  %v3795_v13 = vsel %vm3706_vm7, %v3700_v27, 0.0  ;;  %v3893_v41 = vsel %vm3835_vm3, %v3881_v11, 0  ;;  %v3941_v15 = vld [vmem:[%s6637_s21] sm:$0xff] }
 0x2a0   : > { %v3792_v49 = vadd.f32 %v3791_v35, %v3790_v18  ;;  %3734 = vst.msk [vmem:[%s6637_s21 + $0xd8] sm:$0xff] %vm3706_vm7, %v3699_v59  ;;  %v3793_v10 = vsel %vm3706_vm7, %v3699_v59, 0.0  ;;  %v3630_v20 = vmul.f32 %v6619_v26, %v3591_v5  ;;  %v3592_v24 = vadd.f32 %v6883_v63, %v3399_v28  ;;  %v3943_v35 = vld [vmem:[%s6637_s21 + $0x10] sm:$0xff]  ;;  %v3944_v5 = vld [vmem:[%s6637_s21 + $0x18] sm:$0xff]  ;;  %v3945_v28 = vld [vmem:[%s6637_s21 + $0x20] sm:$0xff] }
 0x2a1   : > { %v3632_v7 = vmul.f32 %v6619_v26, %v3593_v23  ;;  %v3820_v0 = vsub.s32 0, %v3819_v44  ;;  %v3947_v23 = vld [vmem:[%s6637_s21 + $0x30] sm:$0xff] }
 0x2a2   : > { %v3794_v34 = vadd.f32 %v3793_v10, %v3792_v49  ;;  %v3669_v42 = vadd.f32 %v6624_v39, %v3630_v20  ;;  %v3631_v16 = vmul.f32 %v6619_v26, %v3592_v24  ;;  %v3946_v49 = vld [vmem:[%s6637_s21 + $0x28] sm:$0xff]  ;;  %v3948_v10 = vld [vmem:[%s6637_s21 + $0x38] sm:$0xff]  ;;  %v3949_v24 = vld [vmem:[%s6637_s21 + $0x40] sm:$0xff] }
 0x2a3   : > { %v3671_v17 = vadd.f32 %v6624_v39, %v3632_v7  ;;  %v3951_v7 = vld [vmem:[%s6637_s21 + $0x50] sm:$0xff] }
 0x2a4   : > { %v3796_v48 = vadd.f32 %v3795_v13, %v3794_v34  ;;  %v3701_v56 = vmax.f32 %v3669_v42, 0.0  ;;  %v3670_v50 = vadd.f32 %v6624_v39, %v3631_v16  ;;  %v3950_v34 = vld [vmem:[%s6637_s21 + $0x48] sm:$0xff]  ;;  %v3953_v13 = vld [vmem:[%s6637_s21 + $0x60] sm:$0xff]  ;;  %v3952_v42 = vld [vmem:[%s6637_s21 + $0x58] sm:$0xff] }
 0x2a5   : > { %v3703_v37 = vmax.f32 %v3671_v17, 0.0  ;;  %v3954_v16 = vld [vmem:[%s6637_s21 + $0x68] sm:$0xff]  ;;  %v3963_v11 = vld [vmem:[%s6637_s21 + $0xb0] sm:$0xff] }
 0x2a6   : > { %3736 = vst.msk [vmem:[%s6637_s21 + $0xe8] sm:$0xff] %vm3706_vm7, %v3701_v56  ;;  %v3797_v63 = vsel %vm3706_vm7, %v3701_v56, 0.0  ;;  %v3702_v55 = vmax.f32 %v3670_v50, 0.0 }
 0x2a7   : > { %v3798_v3 = vadd.f32 %v3797_v63, %v3796_v48  ;;  %3738 = vst.msk [vmem:[%s6637_s21 + $0xf8] sm:$0xff] %vm3706_vm7, %v3703_v37  ;;  %v3801_v12 = vsel %vm3706_vm7, %v3703_v37, 0.0  ;;  %v3956_v37 = vld [vmem:[%s6637_s21 + $0x78] sm:$0xff]  ;;  %v3955_v63 = vld [vmem:[%s6637_s21 + $0x70] sm:$0xff] }
 0x2a8   : > { %3737 = vst.msk [vmem:[%s6637_s21 + $0xf0] sm:$0xff] %vm3706_vm7, %v3702_v55  ;;  %v3799_v32 = vsel %vm3706_vm7, %v3702_v55, 0.0  ;;  %v3957_v55 = vld [vmem:[%s6637_s21 + $0x80] sm:$0xff] }
 0x2a9   : > { %v3800_v26 = vadd.f32 %v3799_v32, %v3798_v3 }
 0x2ab   : > { %v3802_v53 = vadd.f32 %v3801_v12, %v3800_v26 }
 0x2ad   : > { %v3803_v1 = vrot.slane %v3802_v53, 4 }
 0x2af   : > { %v3804_v61 = vadd.f32 %v3803_v1, %v3802_v53  ;;  %v3958_v53 = vld [vmem:[%s6637_s21 + $0x88] sm:$0xff]  ;;  %v3959_v1 = vld [vmem:[%s6637_s21 + $0x90] sm:$0xff] }
 0x2b1   : > { %v3805_v39 = vrot.slane %v3804_v61, 2 }
 0x2b3   : > { %v3806_v14 = vadd.f32 %v3805_v39, %v3804_v61  ;;  %v3961_v61 = vld [vmem:[%s6637_s21 + $0xa0] sm:$0xff] }
 0x2b5   : > { %v3807_v38 = vrot.slane %v3806_v14, 1 }
 0x2b7   : > { %v3808_v51 = vadd.f32 %v3807_v38, %v3806_v14 }
 0x2b9   : > { %v3809_v45 = vadd.f32 %v3808_v51, %v3739_v46  ;;  %v3960_v51 = vld [vmem:[%s6637_s21 + $0x98] sm:$0xff] }
 0x2bb   : > { %3811 = vst.msk [vmem:[#allocation2] sm:$0x1] %vm324_vm2, %v3809_v45  ;;  %v3962_v45 = vld [vmem:[%s6637_s21 + $0xa8] sm:$0xff] }
 0x2c2   : > { %v3815_v52 = vld [vmem:[#allocation2] sm:$0x1] }
 0x2c3   : > { %v3816_v6 = vmul.f32 0.00390625, %v3815_v52 }
 0x2c5   : > { %v3821_v22 = vrot.slane %v3816_v6, %v3820_v0 }
 0x2c7   : > { %v3823_v33 = vpack.c.bf16 %v3821_v22, %v3821_v22  ;;  %v3965_v22 = vld [vmem:[%s6637_s21 + $0xc0] sm:$0xff] }
 0x2c9   : > { %5208 = vmatmul.mubr.msk.bf16.vlgmr.msra.gmra.mrb[116].mxu1 %vm3706_vm7, %v3823_v33  ;;  %v3966_v33 = vld [vmem:[%s6637_s21 + $0xc8] sm:$0xff] }
 0x2ca   : > { %5212 = vmatpush3.bf16.msra.mxu1 %v3893_v41  ;;  %5213 = vmatprep.mubr.msk.bf16.mxu1 %vm5549_vm5, %v5548_v2 }
 0x39c   : > { %v3873_v47 = vpop.f32.mrb[116].mxu1 }
 0x39d   : > { %v3874_v9 = vadd.f32 %v4519_v54, %v3873_v47  ;;  %v5209_v29 = vpop.f32.mrb[117].mxu1 }
 0x39e   : > { %v3876_v40 = vpop.f32.mrb[118].mxu1  ;;  %v3967_v29 = vld [vmem:[%s6637_s21 + $0xd0] sm:$0xff] }
 0x39f   : > { %v3879_v43 = vmax.f32 %v3874_v9, 0.0  ;;  %v5210_v57 = vpop.f32.mrb[119].mxu1  ;;  %v3969_v40 = vld [vmem:[%s6637_s21 + $0xe0] sm:$0xff] }
 0x3a1   : > { %v3880_v62 = vpack.c.bf16 %v3879_v43, %v3879_v43  ;;  %v3968_v43 = vld [vmem:[%s6637_s21 + $0xd8] sm:$0xff] }
 0x3a3   : > { %5214 = vmatmul.mubr.msk.bf16.vlgmr.msra.gmra.mrb[120].mxu1 %vm3706_vm7, %v3880_v62 }
 0x476   : > { %v3929_v2 = vpop.f32.mrb[120].mxu1 }
 0x477   : > { %v3930_v30 = vadd.f32 %v4521_v19, %v3929_v2  ;;  %v5215_v25 = vpop.f32.mrb[121].mxu1 }
 0x478   : > { %v3932_v58 = vpop.f32.mrb[122].mxu1  ;;  %v3972_v25 = vld [vmem:[%s6637_s21 + $0xf8] sm:$0xff] }
 0x479   : > { %v3935_v21 = vsub.f32 0.0, %v3930_v30  ;;  %v5216_v4 = vpop.f32.mrb[123].mxu1  ;;  %v3970_v30 = vld [vmem:[%s6637_s21 + $0xe8] sm:$0xff]  ;;  %v3971_v58 = vld [vmem:[%s6637_s21 + $0xf0] sm:$0xff] }
 0x47b   : > { %v3936_v18 = vmul.f32 1.442695, %v3935_v21 }
 0x47d   : > { %5520 = vpow2.f32 %v3936_v18 }
 0x487   : > { %v5521_v60 = vpop.eup %5520 }
 0x488   : > { %v3938_v27 = vadd.f32 1.0, %v5521_v60 }
 0x48a   : > { %5522 = vrcp.f32 %v3938_v27 }
 0x494   : > { %v5523_v36 = vpop.eup %5522 }
 0x495   : > { %v3973_v59 = vadd.f32 1.0, %v5523_v36 }
 0x497   : > { %v6974_v20 = vrot.slane %v3973_v59, %v3820_v0 }
 0x499   : > { %v3978_v48 = vmul.f32 %v6974_v20, %v3941_v15  ;;  %v3979_v17 = vmul.f32 %v6974_v20, %v3942_v31  ;;  %v3980_v56 = vmul.f32 %v6974_v20, %v3943_v35  ;;  %v3981_v50 = vmul.f32 %v6974_v20, %v3944_v5 }
 0x49a   : > { %v3982_v3 = vmul.f32 %v6974_v20, %v3945_v28  ;;  %v3983_v32 = vmul.f32 %v6974_v20, %v3946_v49  ;;  %v3984_v26 = vmul.f32 %v6974_v20, %v3947_v23  ;;  %v3985_v12 = vmul.f32 %v6974_v20, %v3948_v10 }
 0x49b   : > { %v3986_v39 = vmul.f32 %v6974_v20, %v3949_v24  ;;  %v3987_v14 = vmul.f32 %v6974_v20, %v3950_v34  ;;  %v3988_v38 = vmul.f32 %v6974_v20, %v3951_v7  ;;  %v3989_v46 = vmul.f32 %v6974_v20, %v3952_v42  ;;  %4010 = vst.msk [vmem:[%s6637_s21] sm:$0xff] %vm3706_vm7, %v3978_v48 }
 0x49c   : > { %4011 = vst.msk [vmem:[%s6637_s21 + $0x8] sm:$0xff] %vm3706_vm7, %v3979_v17  ;;  %4012 = vst.msk [vmem:[%s6637_s21 + $0x10] sm:$0xff] %vm3706_vm7, %v3980_v56  ;;  %v3990_v44 = vmul.f32 %v6974_v20, %v3953_v13  ;;  %v3991_v0 = vmul.f32 %v6974_v20, %v3954_v16  ;;  %v3992_v52 = vmul.f32 %v6974_v20, %v3955_v63 }
 0x49d   : > { %4013 = vst.msk [vmem:[%s6637_s21 + $0x18] sm:$0xff] %vm3706_vm7, %v3981_v50  ;;  %v3993_v6 = vmul.f32 %v6974_v20, %v3956_v37  ;;  %4014 = vst.msk [vmem:[%s6637_s21 + $0x20] sm:$0xff] %vm3706_vm7, %v3982_v3  ;;  %v3994_v41 = vmul.f32 %v6974_v20, %v3957_v55  ;;  %v3995_v54 = vmul.f32 %v6974_v20, %v3958_v53 }
 0x49e   : > { %4015 = vst.msk [vmem:[%s6637_s21 + $0x28] sm:$0xff] %vm3706_vm7, %v3983_v32  ;;  %4016 = vst.msk [vmem:[%s6637_s21 + $0x30] sm:$0xff] %vm3706_vm7, %v3984_v26  ;;  %v3996_v47 = vmul.f32 %v6974_v20, %v3959_v1  ;;  %v3997_v9 = vmul.f32 %v6974_v20, %v3960_v51  ;;  %v3998_v57 = vmul.f32 %v6974_v20, %v3961_v61 }
 0x49f   : > { %4017 = vst.msk [vmem:[%s6637_s21 + $0x38] sm:$0xff] %vm3706_vm7, %v3985_v12  ;;  %4018 = vst.msk [vmem:[%s6637_s21 + $0x40] sm:$0xff] %vm3706_vm7, %v3986_v39  ;;  %v3999_v62 = vmul.f32 %v6974_v20, %v3962_v45  ;;  %v4000_v19 = vmul.f32 %v6974_v20, %v3963_v11  ;;  %v4001_v2 = vmul.f32 %v6974_v20, %v3964_v8 }
 0x4a0   : > { %4019 = vst.msk [vmem:[%s6637_s21 + $0x48] sm:$0xff] %vm3706_vm7, %v3987_v14  ;;  %4020 = vst.msk [vmem:[%s6637_s21 + $0x50] sm:$0xff] %vm3706_vm7, %v3988_v38  ;;  %v4002_v21 = vmul.f32 %v6974_v20, %v3965_v22  ;;  %v4003_v4 = vmul.f32 %v6974_v20, %v3966_v33  ;;  %v4004_v18 = vmul.f32 %v6974_v20, %v3967_v29 }
 0x4a1   : > { %4021 = vst.msk [vmem:[%s6637_s21 + $0x58] sm:$0xff] %vm3706_vm7, %v3989_v46  ;;  %4022 = vst.msk [vmem:[%s6637_s21 + $0x60] sm:$0xff] %vm3706_vm7, %v3990_v44  ;;  %v4005_v60 = vmul.f32 %v6974_v20, %v3968_v43  ;;  %v4006_v27 = vmul.f32 %v6974_v20, %v3969_v40  ;;  %v4007_v36 = vmul.f32 %v6974_v20, %v3970_v30 }
 0x4a2   : > { %4023 = vst.msk [vmem:[%s6637_s21 + $0x68] sm:$0xff] %vm3706_vm7, %v3991_v0  ;;  %4024 = vst.msk [vmem:[%s6637_s21 + $0x70] sm:$0xff] %vm3706_vm7, %v3992_v52  ;;  %v4008_v59 = vmul.f32 %v6974_v20, %v3971_v58  ;;  %v4009_v15 = vmul.f32 %v6974_v20, %v3972_v25 }
 0x4a3   : > { %4025 = vst.msk [vmem:[%s6637_s21 + $0x78] sm:$0xff] %vm3706_vm7, %v3993_v6  ;;  %4026 = vst.msk [vmem:[%s6637_s21 + $0x80] sm:$0xff] %vm3706_vm7, %v3994_v41 }
 0x4a4   : > { %4027 = vst.msk [vmem:[%s6637_s21 + $0x88] sm:$0xff] %vm3706_vm7, %v3995_v54  ;;  %4028 = vst.msk [vmem:[%s6637_s21 + $0x90] sm:$0xff] %vm3706_vm7, %v3996_v47 }
 0x4a5   : > { %4029 = vst.msk [vmem:[%s6637_s21 + $0x98] sm:$0xff] %vm3706_vm7, %v3997_v9  ;;  %4030 = vst.msk [vmem:[%s6637_s21 + $0xa0] sm:$0xff] %vm3706_vm7, %v3998_v57 }
 0x4a6   : > { %4031 = vst.msk [vmem:[%s6637_s21 + $0xa8] sm:$0xff] %vm3706_vm7, %v3999_v62  ;;  %4032 = vst.msk [vmem:[%s6637_s21 + $0xb0] sm:$0xff] %vm3706_vm7, %v4000_v19 }
 0x4a7   : > { %4033 = vst.msk [vmem:[%s6637_s21 + $0xb8] sm:$0xff] %vm3706_vm7, %v4001_v2  ;;  %4034 = vst.msk [vmem:[%s6637_s21 + $0xc0] sm:$0xff] %vm3706_vm7, %v4002_v21 }
 0x4a8   : > { %4035 = vst.msk [vmem:[%s6637_s21 + $0xc8] sm:$0xff] %vm3706_vm7, %v4003_v4  ;;  %4036 = vst.msk [vmem:[%s6637_s21 + $0xd0] sm:$0xff] %vm3706_vm7, %v4004_v18 }
 0x4a9   : > { %4037 = vst.msk [vmem:[%s6637_s21 + $0xd8] sm:$0xff] %vm3706_vm7, %v4005_v60  ;;  %4038 = vst.msk [vmem:[%s6637_s21 + $0xe0] sm:$0xff] %vm3706_vm7, %v4006_v27 }
 0x4aa   : > { %4039 = vst.msk [vmem:[%s6637_s21 + $0xe8] sm:$0xff] %vm3706_vm7, %v4007_v36  ;;  %4040 = vst.msk [vmem:[%s6637_s21 + $0xf0] sm:$0xff] %vm3706_vm7, %v4008_v59 }
 0x4ab   : > { %4041 = vst.msk [vmem:[%s6637_s21 + $0xf8] sm:$0xff] %vm3706_vm7, %v4009_v15 }
 0x4ac PF: > { %s18_s29 = sadd.s32 1, %s5546_s29   ;;  %s7114_s27 = smov %s5542_s28 }
 0x4ad   : > { %p15_p5 = scmp.ge.s32.totalorder %s18_s29, 4   ;;  %s7115_s28 = smov %s7117_s30 }
 0x4af   :  { %17 = sbr.rel (!%p15_p5) target bundleno = 2 (0x2), region = 102 }

</bundles_post_ra>
